<compile_context>
chip_gen: v7x
topology: tpu7x:2x2x1
jax: 0.10.0
libtpu: 0.0.40
codegen_flags: <defaults>
</compile_context>

<pallas_src>
import jax
import jax.numpy as jnp
from jax.experimental import pallas as pl
from jax.experimental.pallas import tpu as pltpu

NEG_SLOPE = 0.01  # torch.nn.LeakyReLU() default


def _leaky(x):
    return jnp.where(x > 0, x, NEG_SLOPE * x)


# ----------------------------------------------------------------------------- kernel
def ctrl_kernel(nf_ref, w_ref, b_ref, out_ref):
    """Fused Ctrl forward for one set (one batch element per grid step).

    nf_ref : (n, 305)      bf16  node features, lanes 300..304 zero
    w_ref  : (7, 305, 305) bf16  [W0, W1, W2, W3a, W3b, C0, C1] (zero-padded to 305)
    b_ref  : (9, 305)      f32   [b0_first, b0_second, b1, b2, b3,
                                  c0b+C0[300+pos], c1b+C1[300+pos],
                                  c2_row, (c2b+c2[300+pos]) @ lane 0]
    out_ref: (1, 1)        f32
    """
    f32 = jnp.float32
    bf16 = jnp.bfloat16
    n = nf_ref.shape[0]
    k = n // 2
    inv_k = 1.0 / k

    b = b_ref[...]                                                   # (9, 305)

    # ---------------- HyperSetEncoder2 (setenc) ----------------
    # fc0: the two label columns are folded into per-half biases.
    row = jax.lax.broadcasted_iota(jnp.int32, (n, 1), 0)
    first_half = row < k                                             # (n, 1)
    bias0 = jnp.where(first_half, b[0:1, :], b[1:2, :])              # (n, 305)
    x = _leaky(jnp.dot(nf_ref[...], w_ref[0],
                       preferred_element_type=f32) + bias0)          # (n, 305)
    # fc1 / fc2 + LeakyReLU + residual (tail lanes stay exactly zero)
    x = _leaky(jnp.dot(x.astype(bf16), w_ref[1],
                       preferred_element_type=f32) + b[2:3, :]) + x
    x = _leaky(jnp.dot(x.astype(bf16), w_ref[2],
                       preferred_element_type=f32) + b[3:4, :]) + x

    # Set pooling over the two halves via masked column sums (no sublane slicing).
    colsum_all = jnp.sum(x, axis=0, keepdims=True)                   # (1, 305)
    colsum_first = jnp.sum(jnp.where(first_half, x, 0.0), axis=0, keepdims=True)
    p0 = colsum_first * inv_k
    p1 = (colsum_all - colsum_first) * inv_k

    # fc3 as a split matmul (no (1,600) concat); sup is (1,305) with zero tail lanes.
    sup = (jnp.dot(p0.astype(bf16), w_ref[3], preferred_element_type=f32)
           + jnp.dot(p1.astype(bf16), w_ref[4], preferred_element_type=f32)
           + b[4:5, :])                                              # (1, 305)

    # ---------------- Ctrl residual head ----------------
    # x0 = [sup | poso] is never materialized: poso is a one-hot folded into the
    # head biases and the residuals are expanded; since sup is already 305 lanes
    # (zero tail), each head layer is a single full-width dot.
    h0 = _leaky(jnp.dot(sup.astype(bf16), w_ref[5],
                        preferred_element_type=f32) + b[5:6, :])     # (1, 305)
    h1 = _leaky(jnp.dot((h0 + sup).astype(bf16), w_ref[6],
                        preferred_element_type=f32) + b[6:7, :])     # (1, 305)

    # Final 305 -> 1 projection as one VPU multiply + one lane reduce.
    out_ref[...] = (jnp.sum((h0 + h1 + sup) * b[7:8, :], axis=-1, keepdims=True)
                    + b[8:9, 0:1])
    # TODO(synk): emit the scalar through an SMEM out_spec instead of a (1,1) VMEM
    #             tile once vector->scalar reduce stores are verified on all targets.


# ----------------------------------------------------------------------------- packing
def pack_params(params, pos=0, g_layer=5, hidden_dim=300):
    """Pack f32 torch-layout params into one bf16 weight slab + one f32 bias slab."""
    H = hidden_dim
    D = H + g_layer                                                  # 305

    def q(w):       # bf16 weight as shipped to the kernel
        return w.astype(jnp.bfloat16)

    def qf(w):      # bf16-rounded weight kept in f32 (for bias folding / final row)
        return w.astype(jnp.bfloat16).astype(jnp.float32)

    def pad_w(w):   # zero-pad a (<=D, <=D) matrix to (D, D)
        return jnp.zeros((D, D), jnp.float32).at[:w.shape[0], :w.shape[1]].set(w)

    def pad_b(v):   # zero-pad a (<=D,) vector to (D,)
        return jnp.zeros((D,), jnp.float32).at[:v.shape[0]].set(v)

    w0, b0 = params["w0"], params["b0"]          # (302,300), (300,)
    w1, b1 = params["w1"], params["b1"]
    w2, b2 = params["w2"], params["b2"]
    w3, b3 = params["w3"], params["b3"]          # (600,300), (300,)
    c0w, c0b = params["c0w"], params["c0b"]      # (305,305), (305,)
    c1w, c1b = params["c1w"], params["c1b"]
    c2w, c2b = params["c2w"], params["c2b"]      # (305,1),   (1,)

    wstack = jnp.stack([q(pad_w(w0[:H])),        # W0  (node-feature part)
                        q(pad_w(w1)),            # W1
                        q(pad_w(w2)),            # W2
                        q(pad_w(w3[:H])),        # W3a (acts on p0)
                        q(pad_w(w3[H:])),        # W3b (acts on p1)
                        q(c0w),                  # C0  (full head weight)
                        q(c1w)])                 # C1  -> (7, 305, 305) bf16

    bstack = jnp.stack([
        pad_b(b0 + qf(w0)[H]),                   # fc0 bias, first half  (label [1,0])
        pad_b(b0 + qf(w0)[H + 1]),               # fc0 bias, second half (label [0,1])
        pad_b(b1),
        pad_b(b2),
        pad_b(b3),
        c0b + qf(c0w)[H + pos],                  # head fc0 bias with poso folded
        c1b + qf(c1w)[H + pos],                  # head fc1 bias with poso folded
        qf(c2w)[:, 0],                           # final projection row
        jnp.zeros((D,), jnp.float32).at[0].set(c2b[0] + qf(c2w)[H + pos, 0]),
    ])                                           # (9, 305) f32
    return dict(wstack=wstack, bstack=bstack)


# ----------------------------------------------------------------------------- wrapper
def ctrl_forward(node_feat, packed):
    """node_feat: (B, n, 300) or (n, 300). Returns (B, 1) or (1, 1)."""
    single = node_feat.ndim == 2
    if single:
        node_feat = node_feat[None]
    B, n, d = node_feat.shape
    assert n % 2 == 0, "Ctrl splits the set into two equal halves"
    D = packed["wstack"].shape[-1]                                   # 305

    # Ship node features as bf16 and lane-pad to 305 (kernel rounds to bf16 anyway).
    nf = jnp.zeros((B, n, D), jnp.bfloat16).at[:, :, :d].set(node_feat.astype(jnp.bfloat16))

    out = pl.pallas_call(
        ctrl_kernel,
        out_shape=jax.ShapeDtypeStruct((B, 1, 1), jnp.float32),
        grid=(B,),
        in_specs=[
            # per-batch-element node features stream through VMEM
            pl.BlockSpec((None, n, D), lambda b: (b, 0, 0)),
            # weights / biases: constant block index -> fetched once, VMEM-resident
            pl.BlockSpec((7, D, D), lambda b: (0, 0, 0)),
            pl.BlockSpec((9, D), lambda b: (0, 0)),
        ],
        out_specs=pl.BlockSpec((None, 1, 1), lambda b: (b, 0, 0)),
        compiler_params=pltpu.CompilerParams(dimension_semantics=("parallel",)),
    )(nf, packed["wstack"], packed["bstack"])
    # TODO(synk): for very large n, additionally tile the row axis and accumulate the
    #             two half-sums in VMEM scratch (pl.when init/finalize) to bound VMEM.
    out = out.reshape(B, 1)
    return out[0:1].reshape(1, 1) if single else out


# ----------------------------------------------------------------------------- params / reference
def init_params(key, inp_dim=300, hidden_dim=300, out_dim=1, g_layer=5):
    """torch.nn.Linear-style init, weights stored as (in, out)."""
    def linear(k, fin, fout):
        kw, kb = jax.random.split(k)
        bound = 1.0 / (fin ** 0.5)
        w = jax.random.uniform(kw, (fin, fout), jnp.float32, -bound, bound)
        b = jax.random.uniform(kb, (fout,), jnp.float32, -bound, bound)
        return w, b

    keys = jax.random.split(key, 7)
    p = {}
    p["w0"], p["b0"] = linear(keys[0], inp_dim + 2, hidden_dim)     # 302 -> 300
    p["w1"], p["b1"] = linear(keys[1], hidden_dim, hidden_dim)      # 300 -> 300
    p["w2"], p["b2"] = linear(keys[2], hidden_dim, hidden_dim)      # 300 -> 300
    p["w3"], p["b3"] = linear(keys[3], 2 * hidden_dim, inp_dim)     # 600 -> 300
    d = inp_dim + g_layer
    p["c0w"], p["c0b"] = linear(keys[4], d, d)                      # 305 -> 305
    p["c1w"], p["c1b"] = linear(keys[5], d, d)                      # 305 -> 305
    p["c2w"], p["c2b"] = linear(keys[6], d, out_dim)                # 305 -> 1
    return p


def _mm(x, w):
    """bf16 matmul with f32 accumulation, matching the kernel's weight quantization."""
    return jnp.dot(x.astype(jnp.bfloat16), w.astype(jnp.bfloat16),
                   preferred_element_type=jnp.float32)


def ctrl_reference(node_feat, params, pos=0, g_layer=5):
    """Pure-JAX port of the PyTorch forward (with bf16 weights), for verification."""
    n, _ = node_feat.shape
    k = n // 2
    ln = jnp.concatenate([jnp.ones((k, 1), jnp.float32), jnp.zeros((k, 1), jnp.float32)], -1)
    lp = jnp.concatenate([jnp.zeros((k, 1), jnp.float32), jnp.ones((k, 1), jnp.float32)], -1)
    x = jnp.concatenate([node_feat, jnp.concatenate([ln, lp], 0)], -1)
    x = _leaky(_mm(x, params["w0"]) + params["b0"])
    x = _leaky(_mm(x, params["w1"]) + params["b1"]) + x
    x = _leaky(_mm(x, params["w2"]) + params["b2"]) + x
    p0 = jnp.mean(x[:k], axis=0, keepdims=True)
    p1 = jnp.mean(x[k:], axis=0, keepdims=True)
    sup = _mm(jnp.concatenate([p0, p1], -1), params["w3"]) + params["b3"]
    poso = jnp.zeros((1, g_layer), jnp.float32).at[0, pos].set(1.0)
    x = jnp.concatenate([sup, poso], -1)
    x = _leaky(_mm(x, params["c0w"]) + params["c0b"]) + x
    x = _leaky(_mm(x, params["c1w"]) + params["c1b"]) + x
    return _mm(x, params["c2w"]) + params["c2b"]


if __name__ == "__main__":
    key = jax.random.PRNGKey(0)
    kp, kx = jax.random.split(key)

    B, n, inp_dim, pos = 4, 8, 300, 2     # n must be even (set is split into 2 halves)
    params = init_params(kp, inp_dim=inp_dim)
    node_feat = jax.random.normal(kx, (B, n, inp_dim), jnp.float32)

    packed = pack_params(params, pos=pos)
    out = jax.block_until_ready(ctrl_forward(node_feat, packed))

    ref = jnp.concatenate([ctrl_reference(node_feat[i], params, pos=pos) for i in range(B)], 0)
    ref = jax.block_until_ready(ref)

    assert out.shape == (B, 1)
    assert jnp.allclose(out, ref, atol=5e-2, rtol=5e-2), (out, ref)

    print("KERNEL_OK")
</pallas_src>

<mosaic_0001>
module attributes {stable_mosaic.version = 11 : i64} {
  func.func @ctrl_kernel(%arg0: i32, %arg1: memref<1x8x305xbf16, #tpu.memory_space<vmem>>, %arg2: memref<7x305x305xbf16, #tpu.memory_space<vmem>>, %arg3: memref<9x305xf32, #tpu.memory_space<vmem>>, %arg4: memref<1x1x1xf32, #tpu.memory_space<vmem>>) attributes {dimension_semantics = [#tpu.dimension_semantics<parallel>], iteration_bounds = array<i64: 4>, scalar_prefetch = 0 : i64, scratch_operands = 0 : i64, tpu.core_type = #tpu.core_type<tc>, window_params = [{transform_indices = @transform_0, window_bounds = array<i64: 1, 8, 305>}, {pipeline_mode = #tpu.pipeline_mode<synchronous>, transform_indices = @transform_1, window_bounds = array<i64: 7, 305, 305>}, {pipeline_mode = #tpu.pipeline_mode<synchronous>, transform_indices = @transform_2, window_bounds = array<i64: 9, 305>}, {transform_indices = @transform_3, window_bounds = array<i64: 1, 1, 1>}]} {
    %c0 = arith.constant 0 : index
    %c0_0 = arith.constant 0 : index
    %0 = vector.load %arg3[%c0, %c0_0] : memref<9x305xf32, #tpu.memory_space<vmem>>, vector<9x305xf32>
    %1 = tpu.iota {dimensions = array<i32: 0>} : vector<8x1xi32>
    %c4_i32 = arith.constant 4 : i32
    %2 = vector.broadcast %c4_i32 : i32 to vector<8x1xi32>
    %3 = arith.cmpi slt, %1, %2 : vector<8x1xi32>
    %4 = vector.extract_strided_slice %0 {offsets = [0, 0], sizes = [1, 305], strides = [1, 1]} : vector<9x305xf32> to vector<1x305xf32>
    %5 = vector.extract_strided_slice %0 {offsets = [1, 0], sizes = [1, 305], strides = [1, 1]} : vector<9x305xf32> to vector<1x305xf32>
    %6 = vector.shape_cast %3 : vector<8x1xi1> to vector<8x1xi1>
    %7 = vector.broadcast %6 : vector<8x1xi1> to vector<8x305xi1>
    %8 = vector.shape_cast %4 : vector<1x305xf32> to vector<1x305xf32>
    %9 = vector.broadcast %8 : vector<1x305xf32> to vector<8x305xf32>
    %10 = vector.shape_cast %5 : vector<1x305xf32> to vector<1x305xf32>
    %11 = vector.broadcast %10 : vector<1x305xf32> to vector<8x305xf32>
    %12 = arith.select %7, %9, %11 : vector<8x305xi1>, vector<8x305xf32>
    %c0_1 = arith.constant 0 : index
    %c0_2 = arith.constant 0 : index
    %c0_3 = arith.constant 0 : index
    %13 = vector.load %arg1[%c0_1, %c0_2, %c0_3] : memref<1x8x305xbf16, #tpu.memory_space<vmem>>, vector<1x8x305xbf16>
    %14 = vector.shape_cast %13 : vector<1x8x305xbf16> to vector<8x305xbf16>
    %c0_4 = arith.constant 0 : index
    %c0_5 = arith.constant 0 : index
    %c0_6 = arith.constant 0 : index
    %15 = vector.load %arg2[%c0_4, %c0_5, %c0_6] : memref<7x305x305xbf16, #tpu.memory_space<vmem>>, vector<1x305x305xbf16>
    %16 = vector.shape_cast %15 : vector<1x305x305xbf16> to vector<305x305xbf16>
    %cst = arith.constant dense<0.000000e+00> : vector<8x305xf32>
    %17 = tpu.matmul %14, %16, %cst {dimension_numbers = #tpu.dot_dimension_numbers<[1], [0], [0], [1], [0, 0, 1, 1], [], []>} : vector<8x305xbf16>, vector<305x305xbf16>, vector<8x305xf32> -> vector<8x305xf32>
    %18 = arith.addf %17, %12 : vector<8x305xf32>
    %cst_7 = arith.constant 0.000000e+00 : f32
    %19 = vector.broadcast %cst_7 : f32 to vector<8x305xf32>
    %20 = arith.cmpf ogt, %18, %19 : vector<8x305xf32>
    %cst_8 = arith.constant 0.00999999977 : f32
    %21 = vector.broadcast %cst_8 : f32 to vector<8x305xf32>
    %22 = arith.mulf %21, %18 : vector<8x305xf32>
    %23 = arith.select %20, %18, %22 : vector<8x305xi1>, vector<8x305xf32>
    %24 = arith.truncf %23 : vector<8x305xf32> to vector<8x305xbf16>
    %c1 = arith.constant 1 : index
    %c0_9 = arith.constant 0 : index
    %c0_10 = arith.constant 0 : index
    %25 = vector.load %arg2[%c1, %c0_9, %c0_10] : memref<7x305x305xbf16, #tpu.memory_space<vmem>>, vector<1x305x305xbf16>
    %26 = vector.shape_cast %25 : vector<1x305x305xbf16> to vector<305x305xbf16>
    %cst_11 = arith.constant dense<0.000000e+00> : vector<8x305xf32>
    %27 = tpu.matmul %24, %26, %cst_11 {dimension_numbers = #tpu.dot_dimension_numbers<[1], [0], [0], [1], [0, 0, 1, 1], [], []>} : vector<8x305xbf16>, vector<305x305xbf16>, vector<8x305xf32> -> vector<8x305xf32>
    %28 = vector.extract_strided_slice %0 {offsets = [2, 0], sizes = [1, 305], strides = [1, 1]} : vector<9x305xf32> to vector<1x305xf32>
    %29 = vector.broadcast %28 : vector<1x305xf32> to vector<8x305xf32>
    %30 = arith.addf %27, %29 : vector<8x305xf32>
    %cst_12 = arith.constant 0.000000e+00 : f32
    %31 = vector.broadcast %cst_12 : f32 to vector<8x305xf32>
    %32 = arith.cmpf ogt, %30, %31 : vector<8x305xf32>
    %cst_13 = arith.constant 0.00999999977 : f32
    %33 = vector.broadcast %cst_13 : f32 to vector<8x305xf32>
    %34 = arith.mulf %33, %30 : vector<8x305xf32>
    %35 = arith.select %32, %30, %34 : vector<8x305xi1>, vector<8x305xf32>
    %36 = arith.addf %35, %23 : vector<8x305xf32>
    %37 = arith.truncf %36 : vector<8x305xf32> to vector<8x305xbf16>
    %c2 = arith.constant 2 : index
    %c0_14 = arith.constant 0 : index
    %c0_15 = arith.constant 0 : index
    %38 = vector.load %arg2[%c2, %c0_14, %c0_15] : memref<7x305x305xbf16, #tpu.memory_space<vmem>>, vector<1x305x305xbf16>
    %39 = vector.shape_cast %38 : vector<1x305x305xbf16> to vector<305x305xbf16>
    %cst_16 = arith.constant dense<0.000000e+00> : vector<8x305xf32>
    %40 = tpu.matmul %37, %39, %cst_16 {dimension_numbers = #tpu.dot_dimension_numbers<[1], [0], [0], [1], [0, 0, 1, 1], [], []>} : vector<8x305xbf16>, vector<305x305xbf16>, vector<8x305xf32> -> vector<8x305xf32>
    %41 = vector.extract_strided_slice %0 {offsets = [3, 0], sizes = [1, 305], strides = [1, 1]} : vector<9x305xf32> to vector<1x305xf32>
    %42 = vector.broadcast %41 : vector<1x305xf32> to vector<8x305xf32>
    %43 = arith.addf %40, %42 : vector<8x305xf32>
    %cst_17 = arith.constant 0.000000e+00 : f32
    %44 = vector.broadcast %cst_17 : f32 to vector<8x305xf32>
    %45 = arith.cmpf ogt, %43, %44 : vector<8x305xf32>
    %cst_18 = arith.constant 0.00999999977 : f32
    %46 = vector.broadcast %cst_18 : f32 to vector<8x305xf32>
    %47 = arith.mulf %46, %43 : vector<8x305xf32>
    %48 = arith.select %45, %43, %47 : vector<8x305xi1>, vector<8x305xf32>
    %49 = arith.addf %48, %36 : vector<8x305xf32>
    %cst_19 = arith.constant dense<0.000000e+00> : vector<305xf32>
    %50 = vector.multi_reduction <add>, %49, %cst_19 [0] : vector<8x305xf32> to vector<305xf32>
    %51 = vector.shape_cast %50 : vector<305xf32> to vector<1x305xf32>
    %cst_20 = arith.constant 0.000000e+00 : f32
    %52 = vector.shape_cast %3 : vector<8x1xi1> to vector<8x1xi1>
    %53 = vector.broadcast %52 : vector<8x1xi1> to vector<8x305xi1>
    %54 = vector.broadcast %cst_20 : f32 to vector<8x305xf32>
    %55 = arith.select %53, %49, %54 : vector<8x305xi1>, vector<8x305xf32>
    %cst_21 = arith.constant dense<0.000000e+00> : vector<305xf32>
    %56 = vector.multi_reduction <add>, %55, %cst_21 [0] : vector<8x305xf32> to vector<305xf32>
    %57 = vector.shape_cast %56 : vector<305xf32> to vector<1x305xf32>
    %cst_22 = arith.constant 2.500000e-01 : f32
    %58 = vector.broadcast %cst_22 : f32 to vector<1x305xf32>
    %59 = arith.mulf %57, %58 : vector<1x305xf32>
    %60 = arith.subf %51, %57 : vector<1x305xf32>
    %cst_23 = arith.constant 2.500000e-01 : f32
    %61 = vector.broadcast %cst_23 : f32 to vector<1x305xf32>
    %62 = arith.mulf %60, %61 : vector<1x305xf32>
    %63 = arith.truncf %59 : vector<1x305xf32> to vector<1x305xbf16>
    %c3 = arith.constant 3 : index
    %c0_24 = arith.constant 0 : index
    %c0_25 = arith.constant 0 : index
    %64 = vector.load %arg2[%c3, %c0_24, %c0_25] : memref<7x305x305xbf16, #tpu.memory_space<vmem>>, vector<1x305x305xbf16>
    %65 = vector.shape_cast %64 : vector<1x305x305xbf16> to vector<305x305xbf16>
    %cst_26 = arith.constant dense<0.000000e+00> : vector<1x305xf32>
    %66 = tpu.matmul %63, %65, %cst_26 {dimension_numbers = #tpu.dot_dimension_numbers<[1], [0], [0], [1], [0, 0, 1, 1], [], []>} : vector<1x305xbf16>, vector<305x305xbf16>, vector<1x305xf32> -> vector<1x305xf32>
    %67 = arith.truncf %62 : vector<1x305xf32> to vector<1x305xbf16>
    %c4 = arith.constant 4 : index
    %c0_27 = arith.constant 0 : index
    %c0_28 = arith.constant 0 : index
    %68 = vector.load %arg2[%c4, %c0_27, %c0_28] : memref<7x305x305xbf16, #tpu.memory_space<vmem>>, vector<1x305x305xbf16>
    %69 = vector.shape_cast %68 : vector<1x305x305xbf16> to vector<305x305xbf16>
    %cst_29 = arith.constant dense<0.000000e+00> : vector<1x305xf32>
    %70 = tpu.matmul %67, %69, %cst_29 {dimension_numbers = #tpu.dot_dimension_numbers<[1], [0], [0], [1], [0, 0, 1, 1], [], []>} : vector<1x305xbf16>, vector<305x305xbf16>, vector<1x305xf32> -> vector<1x305xf32>
    %71 = arith.addf %66, %70 : vector<1x305xf32>
    %72 = vector.extract_strided_slice %0 {offsets = [4, 0], sizes = [1, 305], strides = [1, 1]} : vector<9x305xf32> to vector<1x305xf32>
    %73 = arith.addf %71, %72 : vector<1x305xf32>
    %74 = arith.truncf %73 : vector<1x305xf32> to vector<1x305xbf16>
    %c5 = arith.constant 5 : index
    %c0_30 = arith.constant 0 : index
    %c0_31 = arith.constant 0 : index
    %75 = vector.load %arg2[%c5, %c0_30, %c0_31] : memref<7x305x305xbf16, #tpu.memory_space<vmem>>, vector<1x305x305xbf16>
    %76 = vector.shape_cast %75 : vector<1x305x305xbf16> to vector<305x305xbf16>
    %cst_32 = arith.constant dense<0.000000e+00> : vector<1x305xf32>
    %77 = tpu.matmul %74, %76, %cst_32 {dimension_numbers = #tpu.dot_dimension_numbers<[1], [0], [0], [1], [0, 0, 1, 1], [], []>} : vector<1x305xbf16>, vector<305x305xbf16>, vector<1x305xf32> -> vector<1x305xf32>
    %78 = vector.extract_strided_slice %0 {offsets = [5, 0], sizes = [1, 305], strides = [1, 1]} : vector<9x305xf32> to vector<1x305xf32>
    %79 = arith.addf %77, %78 : vector<1x305xf32>
    %cst_33 = arith.constant 0.000000e+00 : f32
    %80 = vector.broadcast %cst_33 : f32 to vector<1x305xf32>
    %81 = arith.cmpf ogt, %79, %80 : vector<1x305xf32>
    %cst_34 = arith.constant 0.00999999977 : f32
    %82 = vector.broadcast %cst_34 : f32 to vector<1x305xf32>
    %83 = arith.mulf %82, %79 : vector<1x305xf32>
    %84 = arith.select %81, %79, %83 : vector<1x305xi1>, vector<1x305xf32>
    %85 = arith.addf %84, %73 : vector<1x305xf32>
    %86 = arith.truncf %85 : vector<1x305xf32> to vector<1x305xbf16>
    %c6 = arith.constant 6 : index
    %c0_35 = arith.constant 0 : index
    %c0_36 = arith.constant 0 : index
    %87 = vector.load %arg2[%c6, %c0_35, %c0_36] : memref<7x305x305xbf16, #tpu.memory_space<vmem>>, vector<1x305x305xbf16>
    %88 = vector.shape_cast %87 : vector<1x305x305xbf16> to vector<305x305xbf16>
    %cst_37 = arith.constant dense<0.000000e+00> : vector<1x305xf32>
    %89 = tpu.matmul %86, %88, %cst_37 {dimension_numbers = #tpu.dot_dimension_numbers<[1], [0], [0], [1], [0, 0, 1, 1], [], []>} : vector<1x305xbf16>, vector<305x305xbf16>, vector<1x305xf32> -> vector<1x305xf32>
    %90 = vector.extract_strided_slice %0 {offsets = [6, 0], sizes = [1, 305], strides = [1, 1]} : vector<9x305xf32> to vector<1x305xf32>
    %91 = arith.addf %89, %90 : vector<1x305xf32>
    %cst_38 = arith.constant 0.000000e+00 : f32
    %92 = vector.broadcast %cst_38 : f32 to vector<1x305xf32>
    %93 = arith.cmpf ogt, %91, %92 : vector<1x305xf32>
    %cst_39 = arith.constant 0.00999999977 : f32
    %94 = vector.broadcast %cst_39 : f32 to vector<1x305xf32>
    %95 = arith.mulf %94, %91 : vector<1x305xf32>
    %96 = arith.select %93, %91, %95 : vector<1x305xi1>, vector<1x305xf32>
    %97 = arith.addf %84, %96 : vector<1x305xf32>
    %98 = arith.addf %97, %73 : vector<1x305xf32>
    %99 = vector.extract_strided_slice %0 {offsets = [7, 0], sizes = [1, 305], strides = [1, 1]} : vector<9x305xf32> to vector<1x305xf32>
    %100 = arith.mulf %98, %99 : vector<1x305xf32>
    %cst_40 = arith.constant dense<0.000000e+00> : vector<1xf32>
    %101 = vector.multi_reduction <add>, %100, %cst_40 [1] : vector<1x305xf32> to vector<1xf32>
    %102 = vector.shape_cast %101 : vector<1xf32> to vector<1x1xf32>
    %103 = vector.extract_strided_slice %0 {offsets = [8, 0], sizes = [1, 1], strides = [1, 1]} : vector<9x305xf32> to vector<1x1xf32>
    %104 = arith.addf %102, %103 : vector<1x1xf32>
    %c0_41 = arith.constant 0 : index
    %c0_42 = arith.constant 0 : index
    %c0_43 = arith.constant 0 : index
    %105 = vector.load %arg4[%c0_41, %c0_42, %c0_43] : memref<1x1x1xf32, #tpu.memory_space<vmem>>, vector<1x1x1xf32>
    %106 = vector.shape_cast %105 : vector<1x1x1xf32> to vector<1x1xf32>
    %107 = vector.shape_cast %104 : vector<1x1xf32> to vector<1x1x1xf32>
    tpu.vector_store %arg4[%c0_41, %c0_42, %c0_43], %107 {strides = array<i32>} : memref<1x1x1xf32, #tpu.memory_space<vmem>>, vector<1x1x1xf32>,
    return
  }
  func.func @transform_0(%arg0: i32) -> (i32, i32, i32) {
    %c0_i32 = arith.constant 0 : i32
    %c0_i32_0 = arith.constant 0 : i32
    %c0_i32_1 = arith.constant 0 : i32
    return %arg0, %c0_i32, %c0_i32_0 : i32, i32, i32
  }
  func.func @transform_1(%arg0: i32) -> (i32, i32, i32) {
    %c0_i32 = arith.constant 0 : i32
    %c0_i32_0 = arith.constant 0 : i32
    %c0_i32_1 = arith.constant 0 : i32
    %c0_i32_2 = arith.constant 0 : i32
    return %c0_i32, %c0_i32_0, %c0_i32_1 : i32, i32, i32
  }
  func.func @transform_2(%arg0: i32) -> (i32, i32) {
    %c0_i32 = arith.constant 0 : i32
    %c0_i32_0 = arith.constant 0 : i32
    %c0_i32_1 = arith.constant 0 : i32
    return %c0_i32, %c0_i32_0 : i32, i32
  }
  func.func @transform_3(%arg0: i32) -> (i32, i32, i32) {
    %c0_i32 = arith.constant 0 : i32
    %c0_i32_0 = arith.constant 0 : i32
    %c0_i32_1 = arith.constant 0 : i32
    return %arg0, %c0_i32, %c0_i32_0 : i32, i32, i32
  }
}

</mosaic_0001>

<bundles_post_ra>
// kernel: tpu_custom_call.1
= control target key start
LH: loop header
LB: loop body
LE: loop exit
PB: predicated region body
PF: predicated region fallthrough
CT: control target
= control target key end

     0   :  { %8 = vsyncpa [#allocation3], 0  ;;  %s6438_s0 = inlined_call_operand.hbm [shape: bf16[4,8,305], index: 0, kind: input, shape index: {}]   ;;  %s6439_s1 = inlined_call_operand.hbm [shape: bf16[7,305,305], index: 1, kind: input, shape index: {}]   ;;  %s6440_s2 = inlined_call_operand.hbm [shape: f32[9,305], index: 2, kind: input, shape index: {}]   ;;  %s6441_s3 = inlined_call_operand.vmem [shape: f32[4,1,1], index: 3, kind: output, shape index: {}]  }
   0x1   :  { %10 = vsyncpa [#allocation3 + $0x1], 0 }
   0x2   :  { %11 = vsyncpa [#allocation5], 0  ;;  %s6031_s12 = smov 0   ;;  %s6033_s13 = smov 0  }
   0x3   :  { %s6035_s14 = smov 0   ;;  %s6037_s15 = smov 0  }
   0x4 LB: > { %s6050_s16 = sadd.s32 4294967295, %s5999_s15   ;;  %p37_p0 = scmp.ne.s32.totalorder %s5991_s13, %s5987_s12  ;;  %s5999_s15 = sphi %s6037_s15, %s6456_s15   ;;  %s5995_s14 = sphi %s6035_s14, %s6455_s14   ;;  %s5991_s13 = sphi %s6033_s13, %s6454_s13   ;;  %s5987_s12 = sphi %s6031_s12, %s6453_s12  }
   0x5   : > { %p6442_p1 = scmp.eq.s32.totalorder %s6050_s16, 0  ;;  %p4496_p2 = scmp.ge.s32.totalorder %s5999_s15, 1 }
   0x6   : > { %p116_p3 = scmp.lt.s32.totalorder %s5999_s15, 5  ;;  %s6001_s19 = smov [#allocation4]  }
   0x7   : > { %p6058_p4 = por %p6442_p1, %p37_p0  ;;  %s128_s20 = sshll.u32 %s6001_s19, 4  ;;  %s129_s20 = int_to_ptr.vmem [resolvable:$true] %s128_s20 }
   0x8   : > { %p6062_p5 = pnand %p4496_p2, %p116_p3  ;;  %s6002_s22 = smov [#allocation6]  }
   0x9   : > { %s6445_s17 = scalar_select %p6058_p4, 1, 0 }
   0xa   : > { %s6446_s18 = scalar_select %p6062_p5, 1, 0 }
   0xb   : > { %p5259_p6 = pneg %p6062_p5  ;;  %s141_s23 = sshll.u32 %s6002_s22, 4  ;;  %s6074_s23 = int_to_ptr.vmem [resolvable:$true] %s141_s23 }
   0xc   : > { %s5875_s26 = scalar_lea.hbm %s6439_s1, 52416 }
   0xd   : > { %p6070_p7 = pnand %p5259_p6, %p6442_p1  ;;  %p5876_p8 = scmp.ne.s32.totalorder %s6439_s1, %s5875_s26 }
   0xe   : > { %p5882_p12 = scmp.lt.u32.totalorder %s5875_s26, %s6439_s1 }
   0xf   : > { %p5877_p9 = pneg %p6070_p7 }
  0x11   : > { %p5878_p10 = pnand %p5877_p9, %p5876_p8 }
  0x13   : > { %p5879_p11 = pneg %p5878_p10 }
  0x15   : > { %p5884_p13 = pnand %p5882_p12, %p5879_p11 }
  0x17   : > { %5887 = shalt.err (!%p5884_p13)
}
  0x18   : > { %s5888_s4 = scalar_lea.vmem %s129_s20, 52416  ;;  %p5896_p6 = scmp.lt.s32.totalorder %s129_s20, %s129_s20 }
  0x19   : > { %p5889_p0 = scmp.ne.s32.totalorder %s129_s20, %s5888_s4  ;;  %p5897_p1 = scmp.lt.s32.totalorder %s5888_s4, %s5888_s4 }
  0x1b   : > { %p5891_p2 = pnand %p5889_p0, %p5877_p9  ;;  %p5898_p4 = por %p5897_p1, %p5896_p6 }
  0x1d   : > { %p5892_p3 = pneg %p5891_p2 }
  0x1f   : > { %p5899_p5 = pnand %p5898_p4, %p5892_p3 }
  0x21   : > { %5902 = shalt.err (!%p5899_p5)
}
  0x22   : > { %s6003_s5 = smov 192   ;;  %s6004_s6 = smov 12  }
  0x23   : > { %5262 = dma.hbm_to_vmem [thread:$0]  (!%p6070_p7), %s6439_s1, 52416, %s129_s20, [#allocation5], %s6003_s5, %s6003_s5, %s6004_s6  }
  0x24   : > { %s5903_s11 = scalar_lea.hbm %s6440_s2, 768 }
  0x25   : > { %p5904_p8 = scmp.ne.s32.totalorder %s6440_s2, %s5903_s11  ;;  %p5910_p5 = scmp.lt.u32.totalorder %s5903_s11, %s6440_s2 }
  0x27   : > { %p5906_p1 = pnand %p5904_p8, %p5877_p9 }
  0x29   : > { %p5907_p4 = pneg %p5906_p1 }
  0x2b   : > { %p5912_p10 = pnand %p5910_p5, %p5907_p4 }
  0x2d   : > { %5915 = shalt.err (!%p5912_p10)
}
  0x2e   : > { %s5916_s20 = scalar_lea.vmem %s6074_s23, 768  ;;  %p5924_p0 = scmp.lt.s32.totalorder %s6074_s23, %s6074_s23 }
  0x2f   : > { %p5917_p11 = scmp.ne.s32.totalorder %s6074_s23, %s5916_s20  ;;  %p5925_p2 = scmp.lt.s32.totalorder %s5916_s20, %s5916_s20 }
  0x31   : > { %p5919_p12 = pnand %p5917_p11, %p5877_p9  ;;  %p5926_p3 = por %p5925_p2, %p5924_p0 }
  0x33   : > { %p5920_p13 = pneg %p5919_p12 }
  0x35   : > { %p5927_p6 = pnand %p5926_p3, %p5920_p13 }
  0x37   : > { %5930 = shalt.err (!%p5927_p6)
}
  0x38   : > { %s6005_s25 = smov 384   ;;  %s6006_s26 = smov 24  }
  0x39   : > { %5265 = dma.hbm_to_vmem [thread:$0]  (!%p6070_p7), %s6440_s2, 768, %s6074_s23, [#allocation5], %s6005_s25, %s6005_s25, %s6006_s26  }
  0x3a   : > { %s6124_s29 = sadd.s32 1, %s5999_s15   ;;  %s24_s4 = sadd.s32 1, %s5995_s14 }
  0x3b   : > { %s21_s30 = ssub.s32 %s5999_s15, %s6124_s29  ;;  %p31_p8 = scmp.ne.s32.totalorder %s5995_s14, %s5991_s13 }
  0x3c   : > { %p22_p9 = scmp.eq.s32.totalorder %s21_s30, 0  ;;  %p32_p1 = scmp.eq.s32.totalorder %s5999_s15, 0 }
  0x3d   : > { %p5272_p5 = scmp.lt.s32.totalorder %s5999_s15, 4  ;;  %s155_s6 = sand.u32 1, %s5995_s14  }
  0x3e   : > { %s6133_s5 = scalar_select %p22_p9, %s5995_s14, %s24_s4  }
  0x3f   : > { %p33_p4 = por %p32_p1, %p31_p8  ;;  %s5247_s7 = smul.u32 192, %s5999_s15 }
  0x40   : > { %s5246_s8 = smul.u32 12, %s155_s6  ;;  %s156_s15 = scalar_lea.sflag [#allocation3], %s155_s6 }
  0x41   : > { %p6138_p10 = pnand %p5272_p5, %p33_p4  ;;  %s6145_s10 = scalar_lea.hbm %s6438_s0, %s5247_s7 }
  0x42   : > { %s159_s11 = scalar_lea.vmem [#allocation2], %s5246_s8  ;;  %s5931_s19 = scalar_lea.hbm %s6145_s10, 192 }
  0x43   : > { %s167_s12 = sshll.u32 %s159_s11, 4  ;;  %p5932_p7 = scmp.ne.s32.totalorder %s6145_s10, %s5931_s19  ;;  %s6147_s12 = int_to_ptr.vmem [resolvable:$true] %s167_s12 }
  0x44   : > { %p5933_p11 = pneg %p6138_p10  ;;  %s5936_s20 = scalar_lea.hbm %s6438_s0, 768 }
  0x45   : > { %p5937_p0 = scmp.lt.u32.totalorder %s6145_s10, %s6438_s0  ;;  %p5938_p2 = scmp.lt.u32.totalorder %s5936_s20, %s5931_s19 }
  0x46   : > { %p5934_p12 = pnand %p5933_p11, %p5932_p7  ;;  %p5940_p6 = scmp.lt.u32.totalorder %s5931_s19, %s6145_s10 }
  0x47   : > { %p5939_p3 = por %p5938_p2, %p5937_p0 }
  0x48   : > { %p5935_p13 = pneg %p5934_p12 }
  0x49   : > { %p5941_p9 = por %p5940_p6, %p5939_p3 }
  0x4b   : > { %p5942_p8 = pnand %p5941_p9, %p5935_p13 }
  0x4d   : > { %5945 = shalt.err (!%p5942_p8)
}
  0x4e   : > { %s5946_s27 = scalar_lea.vmem %s6147_s12, 192  ;;  %s6007_s28 = smov [#allocation2]  }
  0x4f   : > { %p5947_p1 = scmp.ne.s32.totalorder %s6147_s12, %s5946_s27  ;;  %s5951_s30 = sshll.u32 %s6007_s28, 4  ;;  %s5952_s30 = int_to_ptr.vmem [resolvable:$false] %s5951_s30 }
  0x50   : > { %s5953_s4 = scalar_lea.vmem %s5952_s30, 384  ;;  %p5954_p7 = scmp.lt.s32.totalorder %s6147_s12, %s5952_s30 }
  0x51   : > { %p5949_p4 = pnand %p5947_p1, %p5933_p11  ;;  %p5955_p12 = scmp.lt.s32.totalorder %s5953_s4, %s5946_s27 }
  0x53   : > { %p5950_p5 = pneg %p5949_p4  ;;  %p5956_p0 = por %p5955_p12, %p5954_p7 }
  0x55   : > { %p5957_p2 = pnand %p5956_p0, %p5950_p5 }
  0x57   : > { %5960 = shalt.err (!%p5957_p2)
}
  0x58   : > { %5269 = dma.hbm_to_vmem [thread:$0]  (!%p6138_p10), %s6145_s10, 192, %s6147_s12, %s156_s15  }
  0x59   : > { %p6449_p13 = scmp.ne.s32.totalorder %s6446_s18, 0 }
  0x5a   : > { %s178_s6 = sand.u32 (!%p6449_p13), 1, %s5991_s13   ;;  %p6450_p11 = scmp.ne.s32.totalorder (!%p6449_p13), %s6445_s17, 0 }
  0x5b   : > { %176 = sbr.rel (%p6449_p13) target bundleno = 1845 (0x735), region = 32  ;;  %s179_s8 = scalar_lea.sflag (!%p6449_p13), [#allocation3], %s178_s6 }
  0x5c   : > { %s6177_s7 = smul.u32 (!%p6449_p13), 12, %s178_s6 }
  0x5e   : > { %s182_s23 = scalar_lea.vmem (!%p6449_p13), [#allocation2], %s6177_s7 }
  0x62   : > { %5978 = dma.done.wait (%p6450_p11), %s179_s8, 192  }
  0x63   : > { %5980 = vsyncadd (%p6450_p11), %s179_s8, 4294967104  ;;  %p6451_p3 = scmp.eq.s32.totalorder %s6050_s16, 0 }
  0x65   : > { %5982 = dma.done.wait (%p6451_p3), [#allocation5], 53184   ;;  %p6452_p10 = pmov %p6451_p3 }
  0x66   : > { %v5316_v0 = vld [vmem:[#allocation4 + $0x4] ss:$12 sps:$4 sm:$0xff]   ;;  %v5318_v1 = vld [vmem:[#allocation4] ss:$12 sps:$4 sm:$0xff]   ;;  %v5319_v2 = vld [vmem:[#allocation4 + $0x1c] ss:$12 sps:$4 sm:$0xff]  }
  0x67   : > { %5984 = vsyncadd (%p6452_p10), [#allocation5], 4294914112  ;;  %669 = vmatprep.subr.bf16.mxu0 %v5316_v0  ;;  %v5321_v3 = vld [vmem:[#allocation4 + $0x18] ss:$12 sps:$4 sm:$0xff]   ;;  %v5322_v4 = vld [vmem:[#allocation4 + $0x34] ss:$12 sps:$4 sm:$0xff]  }
  0x68   : > { %670 = vmatpush1.bf16.msra.mxu0 %v5318_v1  ;;  %v5324_v5 = vld [vmem:[#allocation4 + $0x30] ss:$12 sps:$4 sm:$0xff]   ;;  %v5325_v6 = vld [vmem:[#allocation4 + $0x4c] ss:$12 sps:$4 sm:$0xff]   ;;  %v5327_v7 = vld [vmem:[#allocation4 + $0x48] ss:$12 sps:$4 sm:$0xff]  }
  0x69   : > { %671 = vmatprep.subr.bf16.mxu0 %v5319_v2  ;;  %v5328_v8 = vld [vmem:[#allocation4 + $0x64] ss:$12 sps:$4 sm:$0xff]   ;;  %v5345_v9 = vld [vmem:[#allocation4 + $0xc8] ss:$12 sps:$4 sm:$0xff]   ;;  %v5330_v10 = vld [vmem:[#allocation4 + $0x60] ss:$12 sps:$4 sm:$0xff]  }
  0x6a   : > { %4943 = vmatprep.subr.bf16.mxu1 %v5345_v9  ;;  %v5347_v11 = vld [vmem:[#allocation4 + $0x8] ss:$12 sps:$4 sm:$0xff]   ;;  %v5350_v13 = vld [vmem:[#allocation4 + $0xe0] ss:$12 sps:$4 sm:$0xff]   ;;  %v5333_v15 = vld [vmem:[#allocation4 + $0x78] ss:$12 sps:$4 sm:$0xff]  }
  0x6b   : > { %v5331_v12 = vld [vmem:[#allocation4 + $0x7c] ss:$12 sps:$4 sm:$0xff]   ;;  %4944 = vmatpush3.bf16.msra.mxu1 %v5347_v11  ;;  %v5352_v14 = vld [vmem:[#allocation4 + $0x20] ss:$12 sps:$4 sm:$0xff]   ;;  %v5355_v17 = vld [vmem:[#allocation4 + $0xf8] ss:$12 sps:$4 sm:$0xff]  }
  0x6c   : > { %672 = vmatpush1.bf16.msra.mxu0 %v5321_v3  ;;  %4945 = vmatprep.subr.bf16.mxu1 %v5350_v13  ;;  %v5334_v16 = vld [vmem:[#allocation4 + $0x94] ss:$12 sps:$4 sm:$0xff]   ;;  %v5357_v18 = vld [vmem:[#allocation4 + $0x38] ss:$12 sps:$4 sm:$0xff]   ;;  %v5336_v19 = vld [vmem:[#allocation4 + $0x90] ss:$12 sps:$4 sm:$0xff]  }
  0x6d   : > { %673 = vmatprep.subr.bf16.mxu0 %v5322_v4  ;;  %v5360_v20 = vld [vmem:[#allocation4 + $0x110] ss:$12 sps:$4 sm:$0xff]   ;;  %v5337_v21 = vld [vmem:[#allocation4 + $0xac] ss:$12 sps:$4 sm:$0xff]   ;;  %v5339_v23 = vld [vmem:[#allocation4 + $0xa8] ss:$12 sps:$4 sm:$0xff]  }
  0x6e   : > { %v5362_v22 = vld [vmem:[#allocation4 + $0x50] ss:$12 sps:$4 sm:$0xff]   ;;  %v5365_v24 = vld [vmem:[#allocation4 + $0x128] ss:$12 sps:$4 sm:$0xff]   ;;  %v5370_v27 = vld [vmem:[#allocation4 + $0x140] ss:$12 sps:$4 sm:$0xff]  }
  0x6f   : > { %4946 = vmatpush3.bf16.msra.mxu1 %v5352_v14  ;;  %v5340_v25 = vld [vmem:[#allocation4 + $0xc4] ss:$12 sps:$4 sm:$0xff]   ;;  %v5367_v26 = vld [vmem:[#allocation4 + $0x68] ss:$12 sps:$4 sm:$0xff]   ;;  %v5342_v28 = vld [vmem:[#allocation4 + $0xc0] ss:$12 sps:$4 sm:$0xff]  }
  0x70   : > { %674 = vmatpush1.bf16.msra.mxu0 %v5324_v5  ;;  %4947 = vmatprep.subr.bf16.mxu1 %v5355_v17  ;;  %v5343_v29 = vld [vmem:[#allocation4 + $0xdc] ss:$12 sps:$4 sm:$0xff]   ;;  %v5372_v30 = vld [vmem:[#allocation4 + $0x80] ss:$12 sps:$4 sm:$0xff]   ;;  %v5375_v31 = vld [vmem:[#allocation4 + $0x158] ss:$12 sps:$4 sm:$0xff]  }
  0x71   : > { %675 = vmatprep.subr.bf16.mxu0 %v5325_v6  ;;  %v5346_v32 = vld [vmem:[#allocation4 + $0xd8] ss:$12 sps:$4 sm:$0xff]   ;;  %v5348_v34 = vld [vmem:[#allocation4 + $0xf4] ss:$12 sps:$4 sm:$0xff]   ;;  %v5383_v37 = vld [vmem:[#allocation4 + $0x170] ss:$12 sps:$4 sm:$0xff]  }
  0x72   : > { %v251_v33 = vld [vmem:[%s182_s23] sm:$0xff]  ;;  %v5351_v38 = vld [vmem:[#allocation4 + $0xf0] ss:$12 sps:$4 sm:$0xff]   ;;  %v6008_v45 = vmov 0.0   ;;  %vm6009_vm0 = vmmov 0   ;;  %vm657_vm1 = vcmask 1040384  }
  0x73   : > { %4948 = vmatpush3.bf16.msra.mxu1 %v5357_v18  ;;  %v4505_v35 = vcombine.high %v251_v33, %v251_v33  ;;  %v5377_v36 = vld [vmem:[#allocation4 + $0x98] ss:$12 sps:$4 sm:$0xff]   ;;  %v5384_v40 = vld [vmem:[#allocation4 + $0xb0] ss:$12 sps:$4 sm:$0xff]   ;;  %v5356_v41 = vld [vmem:[#allocation4 + $0x108] ss:$12 sps:$4 sm:$0xff]   ;;  %v4504_v44 = vcombine.low %v251_v33, %v251_v33 }
  0x74   : > { %676 = vmatpush1.bf16.msra.mxu0 %v5327_v7  ;;  %4949 = vmatprep.subr.bf16.mxu1 %v5360_v20  ;;  %v5353_v39 = vld [vmem:[#allocation4 + $0x10c] ss:$12 sps:$4 sm:$0xff]   ;;  %v5358_v42 = vld [vmem:[#allocation4 + $0x124] ss:$12 sps:$4 sm:$0xff]   ;;  %v5388_v43 = vld [vmem:[#allocation4 + $0x188] ss:$12 sps:$4 sm:$0xff]  }
  0x75   : > { %677 = vmatprep.subr.bf16.mxu0 %v5328_v8  ;;  %701 = vmatprep.mubr.bf16.mxu0 %v4505_v35  ;;  %v5361_v46 = vld [vmem:[#allocation4 + $0x120] ss:$12 sps:$4 sm:$0xff]   ;;  %v5363_v47 = vld [vmem:[#allocation4 + $0x13c] ss:$12 sps:$4 sm:$0xff]   ;;  %v5366_v49 = vld [vmem:[#allocation4 + $0x138] ss:$12 sps:$4 sm:$0xff]  }
  0x76   : > { %783 = vmatprep.mubr.bf16.mxu1 %v4505_v35  ;;  %v5392_v48 = vld [vmem:[#allocation4 + $0x1a0] ss:$12 sps:$4 sm:$0xff]   ;;  %v5395_v51 = vld [vmem:[#allocation4 + $0x1b8] ss:$12 sps:$4 sm:$0xff]   ;;  %v5371_v53 = vld [vmem:[#allocation4 + $0x150] ss:$12 sps:$4 sm:$0xff]  }
  0x77   : > { %4950 = vmatpush3.bf16.msra.mxu1 %v5362_v22  ;;  %v5368_v50 = vld [vmem:[#allocation4 + $0x154] ss:$12 sps:$4 sm:$0xff]   ;;  %v5397_v52 = vld [vmem:[#allocation4 + $0x1d0] ss:$0 sps:$4 sm:$0x11]   ;;  %v6010_v55 = vmov 0  }
  0x78   : > { %678 = vmatpush1.bf16.msra.mxu0 %v5330_v10  ;;  %4951 = vmatprep.subr.bf16.mxu1 %v5365_v24  ;;  %v5373_v54 = vld [vmem:[#allocation4 + $0x16c] ss:$12 sps:$4 sm:$0xff]   ;;  %v6197_v56 = vsel %vm657_vm1, 65535, %v6010_v55  ;;  %v5376_v59 = vld [vmem:[#allocation4 + $0x168] ss:$12 sps:$4 sm:$0xff]   ;;  %vm653_vm2 = vcmask 400384  }
  0x79   : > { %679 = vmatprep.subr.bf16.mxu0 %v5331_v12  ;;  %v667_v57 = vand.u32 %v5397_v52, %v6197_v56  ;;  %v5400_v58 = vld [vmem:[#allocation4 + $0x1d8] ss:$12 sps:$4 sm:$0xff]   ;;  %v5396_v61 = vld [vmem:[%s182_s23 + $0x8] ss:$0 sps:$4 sm:$0xff]   ;;  %v5398_v62 = vld [vmem:[#allocation4 + $0x1d4] ss:$12 sps:$4 sm:$0xff]  }
  0x7a   : > { %v5382_v60 = vld [vmem:[#allocation4 + $0x184] ss:$12 sps:$4 sm:$0xff]   ;;  %v5380_v0 = vld [vmem:[#allocation4 + $0x180] ss:$12 sps:$4 sm:$0xff]   ;;  %v5387_v1 = vld [vmem:[#allocation4 + $0x19c] ss:$12 sps:$4 sm:$0xff]  }
  0x7b   : > { %4952 = vmatpush3.bf16.msra.mxu1 %v5367_v26  ;;  %v5403_v63 = vld [vmem:[#allocation4 + $0x1f0] ss:$12 sps:$4 sm:$0xff]   ;;  %v329_v2 = vld [vmem:[#allocation4 + $0x1c8] sm:$0x11]  ;;  %v5385_v5 = vld [vmem:[#allocation4 + $0x198] ss:$12 sps:$4 sm:$0xff]  }
  0x7c   : > { %680 = vmatpush1.bf16.msra.mxu0 %v5333_v15  ;;  %4953 = vmatprep.subr.bf16.mxu1 %v5370_v27  ;;  %v5401_v3 = vld [vmem:[#allocation4 + $0x1ec] ss:$12 sps:$4 sm:$0xff]   ;;  %v5406_v4 = vld [vmem:[#allocation4 + $0x208] ss:$12 sps:$4 sm:$0xff]   ;;  %v4565_v7 = vcombine.high %v329_v2, %v329_v2  ;;  %v5404_v8 = vld [vmem:[#allocation4 + $0x204] ss:$12 sps:$4 sm:$0xff]   ;;  %v4564_v11 = vcombine.low %v329_v2, %v329_v2 }
  0x7d   : > { %681 = vmatprep.subr.bf16.mxu0 %v5334_v16  ;;  %v5391_v6 = vld [vmem:[#allocation4 + $0x1b4] ss:$12 sps:$4 sm:$0xff]   ;;  %v5389_v10 = vld [vmem:[#allocation4 + $0x1b0] ss:$12 sps:$4 sm:$0xff]   ;;  %v5412_v14 = vld [vmem:[#allocation4 + $0x238] ss:$12 sps:$4 sm:$0xff]  }
  0x7e   : > { %v5409_v9 = vld [vmem:[#allocation4 + $0x220] ss:$12 sps:$4 sm:$0xff]   ;;  %v664_v12 = vand.u32 %v4565_v7, %v6197_v56  ;;  %v5407_v13 = vld [vmem:[#allocation4 + $0x21c] ss:$12 sps:$4 sm:$0xff]   ;;  %v661_v15 = vand.u32 %v4564_v11, %v6197_v56  ;;  %p211_p6 = scmp.lt.s32.totalorder %s6050_s16, 3 }
  0x7f   : > { %4954 = vmatpush3.bf16.msra.mxu1 %v5372_v30  ;;  %v5410_v16 = vld [vmem:[#allocation4 + $0x234] ss:$12 sps:$4 sm:$0xff]   ;;  %v5415_v17 = vld [vmem:[#allocation4 + $0x250] ss:$12 sps:$4 sm:$0xff]   ;;  %v5435_v24 = vld [vmem:[#allocation4 + $0x2cc] ss:$12 sps:$4 sm:$0xff]  }
  0x80   : > { %682 = vmatpush1.bf16.msra.mxu0 %v5336_v19  ;;  %4955 = vmatprep.subr.bf16.mxu1 %v5375_v31  ;;  %v5425_v18 = vld [vmem:[#allocation4 + $0x29c] ss:$12 sps:$4 sm:$0xff]   ;;  %v5430_v20 = vld [vmem:[#allocation4 + $0x2b4] ss:$12 sps:$4 sm:$0xff]   ;;  %v5436_v27 = vld [vmem:[#allocation4 + $0x20c] ss:$12 sps:$4 sm:$0xff]  }
  0x81   : > { %683 = vmatprep.subr.bf16.mxu0 %v5337_v21  ;;  %v5426_v19 = vld [vmem:[#allocation4 + $0x1dc] ss:$12 sps:$4 sm:$0xff]   ;;  %v5413_v21 = vld [vmem:[#allocation4 + $0x24c] ss:$12 sps:$4 sm:$0xff]   ;;  %v5441_v31 = vld [vmem:[#allocation4 + $0x224] ss:$12 sps:$4 sm:$0xff]  }
  0x82   : > { %v5418_v22 = vld [vmem:[#allocation4 + $0x268] ss:$12 sps:$4 sm:$0xff]   ;;  %v5421_v26 = vld [vmem:[#allocation4 + $0x280] ss:$12 sps:$4 sm:$0xff]   ;;  %v5424_v30 = vld [vmem:[#allocation4 + $0x298] ss:$12 sps:$4 sm:$0xff]  }
  0x83   : > { %4956 = vmatpush3.bf16.msra.mxu1 %v5377_v36  ;;  %v5422_v33 = vld [vmem:[#allocation4 + $0x294] ss:$12 sps:$4 sm:$0xff]   ;;  %v5446_v35 = vld [vmem:[#allocation4 + $0x23c] ss:$12 sps:$4 sm:$0xff]   ;;  %s6458_s16 = smov (!%p211_p6, %s6050_s16), 3 }
  0x84   : > { %684 = vmatpush1.bf16.msra.mxu0 %v5339_v23  ;;  %4957 = vmatprep.subr.bf16.mxu1 %v5383_v37  ;;  %v5431_v23 = vld [vmem:[#allocation4 + $0x1f4] ss:$12 sps:$4 sm:$0xff]   ;;  %v5427_v37 = vld [vmem:[#allocation4 + $0x2ac] ss:$12 sps:$4 sm:$0xff]   ;;  %s213_s21 = scalar_lea.vmem %s6441_s3, %s6458_s16 }
  0x85   : > { %685 = vmatprep.subr.bf16.mxu0 %v5340_v25  ;;  %v5416_v25 = vld [vmem:[#allocation4 + $0x264] ss:$12 sps:$4 sm:$0xff]   ;;  %v5450_v36 = vld [vmem:[#allocation4 + $0x314] ss:$12 sps:$4 sm:$0xff]  }
  0x86   : > { %v5459_v52 = vld [vmem:[#allocation4 + $0x340] ss:$12 sps:$4 sm:$0xff]  }
  0x87   : > { %4958 = vmatpush3.bf16.msra.mxu1 %v5384_v40  ;;  %v5432_v40 = vld [vmem:[#allocation4 + $0x2c4] ss:$12 sps:$4 sm:$0xff]   ;;  %v6211_v2 = vld [vmem:[#allocation6 + $0x10] sm:$0xff] }
  0x88   : > { %686 = vmatpush1.bf16.msra.mxu0 %v5342_v28  ;;  %5132 = vmatprep.subr.bf16.mxu1 %v6008_v45  ;;  %v5440_v28 = vld [vmem:[#allocation4 + $0x2e4] ss:$12 sps:$4 sm:$0xff]  }
  0x89   : > { %687 = vmatprep.subr.bf16.mxu0 %v5343_v29  ;;  %v5419_v29 = vld [vmem:[#allocation4 + $0x27c] ss:$12 sps:$4 sm:$0xff]  }
  0x8a   : > { %784 = vmatmul.mubr.bf16.vlgmr.msra.gmra.mrb[0].mxu1 %v4504_v44 }
  0x8b   : > { %5133 = vmatpush3.bf16.msra.mxu1 %v5388_v43  ;;  %5140 = vmatprep.mubr.msk.bf16.mxu1 %vm6009_vm0, %v6008_v45  ;;  %v5444_v43 = vld [vmem:[#allocation4 + $0x2f8] ss:$12 sps:$4 sm:$0xff]  }
  0x8c   : > { %688 = vmatpush1.bf16.msra.mxu0 %v5346_v32  ;;  %5134 = vmatprep.subr.bf16.mxu1 %v6008_v45  ;;  %v5445_v32 = vld [vmem:[#allocation4 + $0x2fc] ss:$12 sps:$4 sm:$0xff]  }
  0x8d   : > { %689 = vmatprep.subr.bf16.mxu0 %v5348_v34  ;;  %v5429_v34 = vld [vmem:[#allocation4 + $0x2b0] ss:$12 sps:$4 sm:$0xff]  }
  0x8f   : > { %5135 = vmatpush3.bf16.msra.mxu1 %v5392_v48  ;;  %v5454_v48 = vld [vmem:[#allocation4 + $0x328] ss:$12 sps:$4 sm:$0xff]  }
  0x90   : > { %690 = vmatpush1.bf16.msra.mxu0 %v5351_v38  ;;  %5136 = vmatprep.subr.bf16.mxu1 %v6008_v45  ;;  %v5434_v38 = vld [vmem:[#allocation4 + $0x2c8] ss:$12 sps:$4 sm:$0xff]  }
  0x91   : > { %691 = vmatprep.subr.bf16.mxu0 %v5353_v39  ;;  %v5451_v39 = vld [vmem:[#allocation4 + $0x254] ss:$12 sps:$4 sm:$0xff]  }
  0x93   : > { %5137 = vmatpush3.bf16.msra.mxu1 %v5395_v51  ;;  %v5456_v51 = vld [vmem:[#allocation4 + $0x26c] ss:$12 sps:$4 sm:$0xff]  }
  0x94   : > { %692 = vmatpush1.bf16.msra.mxu0 %v5356_v41  ;;  %5138 = vmatprep.subr.bf16.mxu1 %v6008_v45  ;;  %v5439_v41 = vld [vmem:[#allocation4 + $0x2e0] ss:$12 sps:$4 sm:$0xff]  }
  0x95   : > { %693 = vmatprep.subr.bf16.mxu0 %v5358_v42  ;;  %v5437_v42 = vld [vmem:[#allocation4 + $0x2dc] ss:$12 sps:$4 sm:$0xff]  }
  0x97   : > { %5139 = vmatpush3.bf16.msra.mxu1 %v667_v57  ;;  %v5461_v57 = vld [vmem:[#allocation4 + $0x284] ss:$12 sps:$4 sm:$0xff]  }
  0x98   : > { %694 = vmatpush1.bf16.msra.mxu0 %v5361_v46  ;;  %1258 = vmatprep.subr.bf16.mxu1 %v5400_v58  ;;  %v5449_v46 = vld [vmem:[#allocation4 + $0x310] ss:$12 sps:$4 sm:$0xff]   ;;  %v5464_v58 = vld [vmem:[#allocation4 + $0x358] ss:$12 sps:$4 sm:$0xff]  }
  0x99   : > { %695 = vmatprep.subr.bf16.mxu0 %v5363_v47  ;;  %v5447_v47 = vld [vmem:[#allocation4 + $0x30c] ss:$12 sps:$4 sm:$0xff]  }
  0x9a   : > { %5141 = vmatmul.mubr.msk.bf16.vlgmr.msra.gmra.mrb[4].mxu1 %vm653_vm2, %v5396_v61 }
  0x9b   : > { %1259 = vmatpush1.bf16.msra.mxu1 %v5398_v62 }
  0x9c   : > { %696 = vmatpush1.bf16.msra.mxu0 %v5366_v49  ;;  %1260 = vmatprep.subr.bf16.mxu1 %v5403_v63  ;;  %v5455_v49 = vld [vmem:[#allocation4 + $0x32c] ss:$12 sps:$4 sm:$0xff]  }
  0x9d   : > { %697 = vmatprep.subr.bf16.mxu0 %v5368_v50  ;;  %v5452_v50 = vld [vmem:[#allocation4 + $0x324] ss:$12 sps:$4 sm:$0xff]  }
  0x9f   : > { %1261 = vmatpush1.bf16.msra.mxu1 %v5401_v3 }
  0xa0   : > { %698 = vmatpush1.bf16.msra.mxu0 %v5371_v53  ;;  %1262 = vmatprep.subr.bf16.mxu1 %v5406_v4  ;;  %v5460_v53 = vld [vmem:[#allocation4 + $0x344] ss:$12 sps:$4 sm:$0xff]  }
  0xa1   : > { %699 = vmatprep.subr.bf16.mxu0 %v5373_v54  ;;  %v5457_v54 = vld [vmem:[#allocation4 + $0x33c] ss:$12 sps:$4 sm:$0xff]  }
  0xa3   : > { %1263 = vmatpush1.bf16.msra.mxu1 %v5404_v8 }
  0xa4   : > { %700 = vmatpush1.bf16.msra.mxu0 %v5376_v59  ;;  %1264 = vmatprep.subr.bf16.mxu1 %v5409_v9  ;;  %v219_v59 = vlaneseq }
  0xa5   : > { %710 = vmatprep.subr.bf16.mxu0 %v5382_v60 }
  0xa7   : > { %702 = vmatmul.mubr.bf16.vlgmr.msra.gmra.mrb[0].mxu0 %v4504_v44  ;;  %1265 = vmatpush1.bf16.msra.mxu1 %v5407_v13  ;;  %v5442_v44 = vld [vmem:[#allocation4 + $0x2f4] ss:$12 sps:$4 sm:$0xff]  }
  0xa8   : > { %711 = vmatpush1.bf16.msra.mxu0 %v5380_v0  ;;  %742 = vmatprep.mubr.bf16.mxu0 %v6010_v55 }
  0xa9   : > { %712 = vmatprep.subr.bf16.mxu0 %v5387_v1  ;;  %1266 = vmatprep.subr.bf16.mxu1 %v5412_v14  ;;  %v6222_v14 = vld [vmem:[#allocation6] sm:$0xff] }
  0xab   : > { %1267 = vmatpush1.bf16.msra.mxu1 %v5410_v16 }
  0xac   : > { %713 = vmatpush1.bf16.msra.mxu0 %v5385_v5  ;;  %1268 = vmatprep.subr.bf16.mxu1 %v5415_v17 }
  0xad   : > { %714 = vmatprep.subr.bf16.mxu0 %v5391_v6 }
  0xaf   : > { %1269 = vmatpush1.bf16.msra.mxu1 %v5413_v21 }
  0xb0   : > { %715 = vmatpush1.bf16.msra.mxu0 %v5389_v10  ;;  %1270 = vmatprep.subr.bf16.mxu1 %v5418_v22 }
  0xb1   : > { %716 = vmatprep.subr.bf16.mxu0 %v664_v12 }
  0xb3   : > { %1271 = vmatpush1.bf16.msra.mxu1 %v5416_v25 }
  0xb4   : > { %717 = vmatpush1.bf16.msra.mxu0 %v661_v15  ;;  %1272 = vmatprep.subr.bf16.mxu1 %v5421_v26  ;;  %v6224_v15 = vld [vmem:[#allocation6 + $0x8] sm:$0xff] }
  0xb5   : > { %4970 = vmatprep.subr.bf16.mxu0 %v5425_v18 }
  0xb7   : > { %4567 = vmatmul.mubr.msk.bf16.vlgmr.msra.gmra.mrb[0].mxu0 %vm653_vm2, %v5396_v61  ;;  %1273 = vmatpush1.bf16.msra.mxu1 %v5419_v29  ;;  %v6209_v61 = vshrl.u32 %v219_v59, 7  ;;  %v5482_v59 = vld [vmem:[#allocation4 + $0x3c4] ss:$12 sps:$4 sm:$0xff]  }
  0xb8   : > { %4971 = vmatpush3.bf16.msra.mxu0 %v5426_v19  ;;  %1274 = vmatprep.subr.bf16.mxu1 %v5424_v30 }
  0xb9   : > { %4972 = vmatprep.subr.bf16.mxu0 %v5430_v20  ;;  %v226_v3 = vsub.s32 0, %v6209_v61  ;;  %v238_v4 = vsub.s32 1, %v6209_v61  ;;  %vm221_vm3 = vcmp.lt.s32.totalorder %v6209_v61, 4 }
  0xbb   : > { %1275 = vmatpush1.bf16.msra.mxu1 %v5422_v33  ;;  %v235_v5 = vrot.slane %v6211_v2, %v226_v3  ;;  %v247_v6 = vrot.slane %v6211_v2, %v238_v4  ;;  %v227_v16 = vrot.slane %v6222_v14, %v226_v3  ;;  %v239_v17 = vrot.slane %v6222_v14, %v238_v4  ;;  %v5462_v33 = vld [vmem:[#allocation4 + $0x354] ss:$12 sps:$4 sm:$0xff]  }
  0xbc   : > { %4973 = vmatpush3.bf16.msra.mxu0 %v5431_v23  ;;  %1276 = vmatprep.subr.bf16.mxu1 %v5429_v34  ;;  %v231_v18 = vrot.slane %v6224_v15, %v226_v3  ;;  %v243_v19 = vrot.slane %v6224_v15, %v238_v4  ;;  %v5465_v34 = vld [vmem:[#allocation4 + $0x35c] ss:$12 sps:$4 sm:$0xff]   ;;  %v5488_v3 = vld [vmem:[#allocation4 + $0x3f4] ss:$12 sps:$4 sm:$0xff]  }
  0xbd   : > { %4974 = vmatprep.subr.bf16.mxu0 %v5435_v24  ;;  %v250_v7 = vsel %vm221_vm3, %v235_v5, %v247_v6  ;;  %v248_v20 = vsel %vm221_vm3, %v227_v16, %v239_v17  ;;  %v5486_v4 = vld [vmem:[#allocation4 + $0x3f0] ss:$12 sps:$4 sm:$0xff]   ;;  %v5491_v5 = vld [vmem:[#allocation4 + $0x40c] ss:$12 sps:$4 sm:$0xff]   ;;  %v5489_v6 = vld [vmem:[#allocation4 + $0x408] ss:$12 sps:$4 sm:$0xff]  }
  0xbe   : > { %v249_v21 = vsel %vm221_vm3, %v231_v18, %v243_v19  ;;  %v5501_v16 = vld [vmem:[#allocation4 + $0x468] ss:$12 sps:$4 sm:$0xff]   ;;  %v5508_v17 = vld [vmem:[#allocation4 + $0x484] ss:$12 sps:$4 sm:$0xff]   ;;  %v5506_v18 = vld [vmem:[#allocation4 + $0x480] ss:$12 sps:$4 sm:$0xff]  }
  0xbf   : > { %1277 = vmatpush1.bf16.msra.mxu1 %v5427_v37  ;;  %v920_v37 = vld [vmem:[#allocation4 + $0x39c] sm:$0x11] }
  0xc0   : > { %4975 = vmatpush3.bf16.msra.mxu0 %v5436_v27  ;;  %1278 = vmatprep.subr.bf16.mxu1 %v5434_v38  ;;  %v5466_v38 = vld [vmem:[#allocation4 + $0x36c] ss:$12 sps:$4 sm:$0xff]   ;;  %v5513_v19 = vld [vmem:[#allocation4 + $0x49c] ss:$12 sps:$4 sm:$0xff]  }
  0xc1   : > { %4976 = vmatprep.subr.bf16.mxu0 %v5440_v28 }
  0xc3   : > { %1279 = vmatpush1.bf16.msra.mxu1 %v5432_v40  ;;  %v5472_v40 = vld [vmem:[#allocation4 + $0x388] ss:$12 sps:$4 sm:$0xff]  }
  0xc4   : > { %4977 = vmatpush3.bf16.msra.mxu0 %v5441_v31  ;;  %1280 = vmatprep.subr.bf16.mxu1 %v5439_v41  ;;  %v4627_v41 = vcombine.high %v920_v37, %v920_v37 }
  0xc5   : > { %4978 = vmatprep.subr.bf16.mxu0 %v5445_v32 }
  0xc7   : > { %1281 = vmatpush1.bf16.msra.mxu1 %v5437_v42  ;;  %v5470_v42 = vld [vmem:[#allocation4 + $0x384] ss:$12 sps:$4 sm:$0xff]  }
  0xc8   : > { %4979 = vmatpush3.bf16.msra.mxu0 %v5446_v35  ;;  %1282 = vmatprep.subr.bf16.mxu1 %v5444_v43  ;;  %v5473_v43 = vld [vmem:[#allocation4 + $0x38c] ss:$12 sps:$4 sm:$0xff]  }
  0xc9   : > { %4980 = vmatprep.subr.bf16.mxu0 %v5450_v36  ;;  %v5468_v36 = vld [vmem:[#allocation4 + $0x370] ss:$12 sps:$4 sm:$0xff]  }
  0xcb   : > { %1283 = vmatpush1.bf16.msra.mxu1 %v5442_v44  ;;  %v4626_v44 = vcombine.low %v920_v37, %v920_v37  ;;  %v5533_v37 = vld [vmem:[#allocation4 + $0x4fc] ss:$12 sps:$4 sm:$0xff]  }
  0xcc   : > { %4981 = vmatpush3.bf16.msra.mxu0 %v5451_v39  ;;  %1284 = vmatprep.subr.bf16.mxu1 %v5449_v46  ;;  %v5469_v39 = vld [vmem:[#allocation4 + $0x374] ss:$12 sps:$4 sm:$0xff]   ;;  %v5476_v46 = vld [vmem:[#allocation4 + $0x3a4] ss:$0 sps:$4 sm:$0x11]  }
  0xcd   : > { %4982 = vmatprep.subr.bf16.mxu0 %v5455_v49  ;;  %v1250_v49 = vand.u32 %v4626_v44, %v6197_v56  ;;  %v5540_v44 = vld [vmem:[#allocation4 + $0x458] ss:$12 sps:$4 sm:$0xff]  }
  0xcf   : > { %1285 = vmatpush1.bf16.msra.mxu1 %v5447_v47  ;;  %v1253_v47 = vand.u32 %v4627_v41, %v6197_v56  ;;  %v5538_v41 = vld [vmem:[#allocation4 + $0x514] ss:$12 sps:$4 sm:$0xff]  }
  0xd0   : > { %1286 = vmatprep.subr.bf16.mxu1 %v5454_v48  ;;  %4983 = vmatpush3.bf16.msra.mxu0 %v5456_v51  ;;  %v5479_v51 = vld [vmem:[#allocation4 + $0x3ac] ss:$12 sps:$4 sm:$0xff]  }
  0xd1   : > { %4984 = vmatprep.subr.bf16.mxu0 %v5460_v53 }
  0xd3   : > { %1287 = vmatpush1.bf16.msra.mxu1 %v5452_v50  ;;  %v1256_v50 = vand.u32 %v5476_v46, %v6197_v56  ;;  %v5543_v46 = vld [vmem:[#allocation4 + $0x52c] ss:$12 sps:$4 sm:$0xff]  }
  0xd4   : > { %1288 = vmatprep.subr.bf16.mxu1 %v5459_v52  ;;  %4985 = vmatpush3.bf16.msra.mxu0 %v5461_v57  ;;  %v5504_v52 = vld [vmem:[#allocation4 + $0x470] ss:$12 sps:$4 sm:$0xff]  }
  0xd5   : > { %5144 = vmatprep.subr.bf16.mxu0 %v6008_v45  ;;  %v5505_v57 = vld [vmem:[#allocation4 + $0x3b0] ss:$12 sps:$4 sm:$0xff]  }
  0xd7   : > { %1289 = vmatpush1.bf16.msra.mxu1 %v5457_v54  ;;  %v5477_v54 = vld [vmem:[#allocation4 + $0x3a8] ss:$12 sps:$4 sm:$0xff]  }
  0xd8   : > { %1299 = vmatprep.subr.bf16.mxu1 %v5464_v58 }
 0x15d   : > { %v4959_v60 = vpop.f32.mrb[0].mxu1 }
 0x15e   : > { %v4960_v62 = vpop.f32.mrb[1].mxu1 }
 0x15f   : > { %v4961_v63 = vadd.f32 %v4960_v62, %v4959_v60  ;;  %v4962_v0 = vpop.f32.mrb[2].mxu1  ;;  %v5509_v60 = vld [vmem:[#allocation4 + $0x488] ss:$12 sps:$4 sm:$0xff]   ;;  %v5480_v62 = vld [vmem:[#allocation4 + $0x3c0] ss:$12 sps:$4 sm:$0xff]  }
 0x160   : > { %v4963_v1 = vpop.f32.mrb[3].mxu1  ;;  %v5485_v0 = vld [vmem:[#allocation4 + $0x3dc] ss:$12 sps:$4 sm:$0xff]  }
 0x161   : > { %v786_v8 = vadd.f32 %v4961_v63, %v250_v7  ;;  %v5510_v63 = vld [vmem:[#allocation4 + $0x3c8] ss:$12 sps:$4 sm:$0xff]   ;;  %v5483_v1 = vld [vmem:[#allocation4 + $0x3d8] ss:$12 sps:$4 sm:$0xff]  }
 0x162   : > { %v5494_v7 = vld [vmem:[#allocation4 + $0x424] ss:$12 sps:$4 sm:$0xff]  }
 0x16d   : > { %v825_v9 = vpop.f32.mrb[4].mxu1 }
 0x16e   : > { %v6220_v10 = vadd.f32 %v825_v9, %v786_v8  ;;  %v5142_v11 = vpop.f32.mrb[5].mxu1  ;;  %v5492_v8 = vld [vmem:[#allocation4 + $0x420] ss:$12 sps:$4 sm:$0xff]   ;;  %v5497_v9 = vld [vmem:[#allocation4 + $0x43c] ss:$12 sps:$4 sm:$0xff]  }
 0x16f   : > { %v828_v12 = vpop.f32.mrb[6].mxu1  ;;  %v5500_v11 = vld [vmem:[#allocation4 + $0x454] ss:$12 sps:$4 sm:$0xff]  }
 0x170   : > { %v5143_v13 = vpop.f32.mrb[7].mxu1  ;;  %v836_v48 = vmul.f32 0.01, %v6220_v10  ;;  %vm833_vm6 = vcmp.gt.f32.partialorder %v6220_v10, 0.0  ;;  %v5498_v12 = vld [vmem:[#allocation4 + $0x450] ss:$12 sps:$4 sm:$0xff]  }
 0x171   : > { %v5503_v13 = vld [vmem:[#allocation4 + $0x46c] ss:$12 sps:$4 sm:$0xff]  }
 0x172   : > { %v6254_v53 = vsel %vm833_vm6, %v6220_v10, %v836_v48  ;;  %v5495_v10 = vld [vmem:[#allocation4 + $0x438] ss:$12 sps:$4 sm:$0xff]  }
 0x173   : > { %v842_v58 = vpack.c.bf16 %v6254_v53, %v6254_v53 }
 0x18a   : > { %v744_v22 = vpop.f32.mrb[0].mxu0 }
 0x18b   : > { %v5216_v23 = vadd.f32 %v744_v22, %v248_v20  ;;  %v746_v24 = vpop.f32.mrb[1].mxu0  ;;  %v5514_v20 = vld [vmem:[#allocation4 + $0x4a0] ss:$12 sps:$4 sm:$0xff]  }
 0x18c   : > { %v5217_v25 = vadd.f32 %v746_v24, %v249_v21  ;;  %v748_v26 = vpop.f32.mrb[2].mxu0  ;;  %v5511_v21 = vld [vmem:[#allocation4 + $0x498] ss:$12 sps:$4 sm:$0xff]   ;;  %v5515_v22 = vld [vmem:[#allocation4 + $0x3e0] ss:$12 sps:$4 sm:$0xff]  }
 0x18d   : > { %vm831_vm4 = vcmp.gt.f32.partialorder %v5216_v23, 0.0  ;;  %v834_v27 = vmul.f32 0.01, %v5216_v23  ;;  %v749_v28 = vpop.f32.mrb[3].mxu0  ;;  %v5519_v24 = vld [vmem:[#allocation4 + $0x4b8] ss:$12 sps:$4 sm:$0xff]  }
 0x18e   : > { %vm832_vm5 = vcmp.gt.f32.partialorder %v5217_v25, 0.0  ;;  %v835_v29 = vmul.f32 0.01, %v5217_v25  ;;  %v5520_v26 = vld [vmem:[#allocation4 + $0x3f8] ss:$12 sps:$4 sm:$0xff]  }
 0x18f   : > { %v6234_v30 = vsel %vm831_vm4, %v5216_v23, %v834_v27  ;;  %v5518_v23 = vld [vmem:[#allocation4 + $0x4b4] ss:$12 sps:$4 sm:$0xff]   ;;  %v5523_v27 = vld [vmem:[#allocation4 + $0x4cc] ss:$12 sps:$4 sm:$0xff]   ;;  %v5524_v28 = vld [vmem:[#allocation4 + $0x4d0] ss:$12 sps:$4 sm:$0xff]  }
 0x190   : > { %v6236_v31 = vsel %vm832_vm5, %v5217_v25, %v835_v29  ;;  %v840_v35 = vpack.c.bf16 %v6234_v30, %v6234_v30  ;;  %v5516_v25 = vld [vmem:[#allocation4 + $0x4b0] ss:$12 sps:$4 sm:$0xff]   ;;  %v5521_v29 = vld [vmem:[#allocation4 + $0x4c8] ss:$12 sps:$4 sm:$0xff]   ;;  %vm4409_vm4 = vcmask 393216   ;;  %vm4415_vm5 = vcmask 0  }
 0x191   : > { %v841_v32 = vpack.c.bf16 %v6236_v31, %v6236_v31 }
 0x193   : > { %1290 = vmatprep.mubr.bf16.mxu1 %v841_v32  ;;  %1372 = vmatprep.mubr.bf16.mxu0 %v841_v32  ;;  %v5525_v32 = vld [vmem:[#allocation4 + $0x410] ss:$12 sps:$4 sm:$0xff]  }
 0x194   : > { %1291 = vmatmul.mubr.bf16.vlgmr.msra.gmra.mrb[8].mxu1 %v840_v35  ;;  %1373 = vmatmul.mubr.bf16.vlgmr.msra.gmra.mrb[4].mxu0 %v840_v35  ;;  %v5526_v35 = vld [vmem:[#allocation4 + $0x4e0] ss:$12 sps:$4 sm:$0xff]  }
 0x195   : > { %1300 = vmatpush1.bf16.msra.mxu1 %v5462_v33  ;;  %5145 = vmatpush3.bf16.msra.mxu0 %v5465_v34  ;;  %v5528_v33 = vld [vmem:[#allocation4 + $0x4e4] ss:$12 sps:$4 sm:$0xff]   ;;  %v5529_v34 = vld [vmem:[#allocation4 + $0x4e8] ss:$12 sps:$4 sm:$0xff]  }
 0x196   : > { %1301 = vmatprep.subr.bf16.mxu1 %v5468_v36  ;;  %5146 = vmatprep.subr.bf16.mxu0 %v6008_v45  ;;  %v5530_v36 = vld [vmem:[#allocation4 + $0x428] ss:$12 sps:$4 sm:$0xff]  }
 0x197   : > { %1331 = vmatprep.mubr.bf16.mxu1 %v6010_v55  ;;  %5152 = vmatprep.mubr.msk.bf16.mxu0 %vm6009_vm0, %v6008_v45 }
 0x199   : > { %1302 = vmatpush1.bf16.msra.mxu1 %v5466_v38  ;;  %5147 = vmatpush3.bf16.msra.mxu0 %v5469_v39  ;;  %v5534_v38 = vld [vmem:[#allocation4 + $0x500] ss:$12 sps:$4 sm:$0xff]   ;;  %v5531_v39 = vld [vmem:[#allocation4 + $0x4f8] ss:$12 sps:$4 sm:$0xff]  }
 0x19a   : > { %1303 = vmatprep.subr.bf16.mxu1 %v5472_v40  ;;  %5148 = vmatprep.subr.bf16.mxu0 %v6008_v45  ;;  %v5535_v40 = vld [vmem:[#allocation4 + $0x440] ss:$12 sps:$4 sm:$0xff]  }
 0x19d   : > { %1304 = vmatpush1.bf16.msra.mxu1 %v5470_v42  ;;  %5149 = vmatpush3.bf16.msra.mxu0 %v5473_v43  ;;  %v5539_v42 = vld [vmem:[#allocation4 + $0x518] ss:$12 sps:$4 sm:$0xff]   ;;  %v5536_v43 = vld [vmem:[#allocation4 + $0x510] ss:$12 sps:$4 sm:$0xff]  }
 0x19e   : > { %1305 = vmatprep.subr.bf16.mxu1 %v1253_v47  ;;  %5150 = vmatprep.subr.bf16.mxu0 %v6008_v45 }
 0x1a1   : > { %1306 = vmatpush1.bf16.msra.mxu1 %v1250_v49  ;;  %5151 = vmatpush3.bf16.msra.mxu0 %v1256_v50 }
 0x1a2   : > { %1850 = vmatprep.subr.bf16.mxu0 %v5479_v51  ;;  %4997 = vmatprep.subr.bf16.mxu1 %v5504_v52  ;;  %v924_v52 = vsub.s32 2, %v6209_v61 }
 0x1a4   : > { %4629 = vmatmul.mubr.msk.bf16.vlgmr.msra.gmra.mrb[8].mxu1 %vm653_vm2, %v842_v58  ;;  %5153 = vmatmul.mubr.msk.bf16.vlgmr.msra.gmra.mrb[8].mxu0 %vm653_vm2, %v842_v58  ;;  %v929_v58 = vrot.slane %v6224_v15, %v924_v52 }
 0x1a5   : > { %1851 = vmatpush1.bf16.msra.mxu0 %v5477_v54  ;;  %4998 = vmatpush3.bf16.msra.mxu1 %v5505_v57  ;;  %v933_v54 = vrot.slane %v6211_v2, %v924_v52  ;;  %v925_v57 = vrot.slane %v6222_v14, %v924_v52  ;;  %v5579_v52 = vld [vmem:[#allocation4 + $0x7fc] ss:$12 sps:$4 sm:$0xff]  }
 0x1a6   : > { %1852 = vmatprep.subr.bf16.mxu0 %v5482_v59  ;;  %4999 = vmatprep.subr.bf16.mxu1 %v5509_v60 }
 0x1a9   : > { %1853 = vmatpush1.bf16.msra.mxu0 %v5480_v62  ;;  %5000 = vmatpush3.bf16.msra.mxu1 %v5510_v63 }
 0x1aa   : > { %1854 = vmatprep.subr.bf16.mxu0 %v5485_v0  ;;  %5001 = vmatprep.subr.bf16.mxu1 %v5514_v20 }
 0x1ad   : > { %1855 = vmatpush1.bf16.msra.mxu0 %v5483_v1  ;;  %5002 = vmatpush3.bf16.msra.mxu1 %v5515_v22  ;;  %v1512_v22 = vld [vmem:[#allocation4 + $0x570] sm:$0x11] }
 0x1ae   : > { %1856 = vmatprep.subr.bf16.mxu0 %v5488_v3  ;;  %5003 = vmatprep.subr.bf16.mxu1 %v5519_v24  ;;  %v4689_v24 = vcombine.high %v1512_v22, %v1512_v22 }
 0x1b1   : > { %1857 = vmatpush1.bf16.msra.mxu0 %v5486_v4  ;;  %5004 = vmatpush3.bf16.msra.mxu1 %v5520_v26  ;;  %v5549_v26 = vld [vmem:[#allocation4 + $0x558] ss:$12 sps:$4 sm:$0xff]  }
 0x1b2   : > { %1858 = vmatprep.subr.bf16.mxu0 %v5491_v5  ;;  %5005 = vmatprep.subr.bf16.mxu1 %v5524_v28  ;;  %v4688_v28 = vcombine.low %v1512_v22, %v1512_v22  ;;  %v5614_v22 = vld [vmem:[#allocation4 + $0x8bc] ss:$12 sps:$4 sm:$0xff]  }
 0x1b5   : > { %1859 = vmatpush1.bf16.msra.mxu0 %v5489_v6  ;;  %5006 = vmatpush3.bf16.msra.mxu1 %v5525_v32  ;;  %v1845_v32 = vand.u32 %v4689_v24, %v6197_v56  ;;  %v5615_v24 = vld [vmem:[#allocation4 + $0x818] ss:$12 sps:$4 sm:$0xff]  }
 0x1b6   : > { %1860 = vmatprep.subr.bf16.mxu0 %v5494_v7  ;;  %5007 = vmatprep.subr.bf16.mxu1 %v5529_v34  ;;  %v1842_v34 = vand.u32 %v4688_v28, %v6197_v56 }
 0x1b9   : > { %1861 = vmatpush1.bf16.msra.mxu0 %v5492_v8  ;;  %5008 = vmatpush3.bf16.msra.mxu1 %v5530_v36 }
 0x1ba   : > { %1862 = vmatprep.subr.bf16.mxu0 %v5497_v9  ;;  %5009 = vmatprep.subr.bf16.mxu1 %v5534_v38  ;;  %v5556_v38 = vld [vmem:[#allocation4 + $0x750] ss:$12 sps:$4 sm:$0xff]  }
 0x1bd   : > { %1863 = vmatpush1.bf16.msra.mxu0 %v5495_v10  ;;  %5010 = vmatpush3.bf16.msra.mxu1 %v5535_v40  ;;  %v5561_v40 = vld [vmem:[#allocation4 + $0x76c] ss:$12 sps:$4 sm:$0xff]  }
 0x1be   : > { %1864 = vmatprep.subr.bf16.mxu0 %v5500_v11  ;;  %5011 = vmatprep.subr.bf16.mxu1 %v5539_v42  ;;  %v5562_v42 = vld [vmem:[#allocation4 + $0x780] ss:$12 sps:$4 sm:$0xff]  }
 0x1c1   : > { %1865 = vmatpush1.bf16.msra.mxu0 %v5498_v12  ;;  %5012 = vmatpush3.bf16.msra.mxu1 %v5540_v44  ;;  %v5565_v44 = vld [vmem:[#allocation4 + $0x798] ss:$12 sps:$4 sm:$0xff]  }
 0x1c2   : > { %1866 = vmatprep.subr.bf16.mxu0 %v5503_v13  ;;  %5156 = vmatprep.subr.bf16.mxu1 %v6008_v45 }
 0x1c5   : > { %1867 = vmatpush1.bf16.msra.mxu0 %v5501_v16 }
 0x1c6   : > { %1868 = vmatprep.subr.bf16.mxu0 %v5508_v17 }
 0x1c9   : > { %1869 = vmatpush1.bf16.msra.mxu0 %v5506_v18  ;;  %v5541_v18 = vld [vmem:[#allocation4 + $0x528] ss:$12 sps:$4 sm:$0xff]  }
 0x1ca   : > { %1870 = vmatprep.subr.bf16.mxu0 %v5513_v19  ;;  %v5544_v19 = vld [vmem:[#allocation4 + $0x530] ss:$12 sps:$4 sm:$0xff]  }
 0x1cd   : > { %1871 = vmatpush1.bf16.msra.mxu0 %v5511_v21  ;;  %v5547_v21 = vld [vmem:[#allocation4 + $0x544] ss:$12 sps:$4 sm:$0xff]  }
 0x1ce   : > { %1872 = vmatprep.subr.bf16.mxu0 %v5518_v23  ;;  %v5548_v23 = vld [vmem:[#allocation4 + $0x548] ss:$12 sps:$4 sm:$0xff]  }
 0x1d1   : > { %1873 = vmatpush1.bf16.msra.mxu0 %v5516_v25 }
 0x1d2   : > { %1874 = vmatprep.subr.bf16.mxu0 %v5523_v27  ;;  %v5552_v27 = vld [vmem:[#allocation4 + $0x560] ss:$12 sps:$4 sm:$0xff]  }
 0x1d5   : > { %1875 = vmatpush1.bf16.msra.mxu0 %v5521_v29  ;;  %v5555_v29 = vld [vmem:[#allocation4 + $0x578] ss:$0 sps:$4 sm:$0x11]  }
 0x1d6   : > { %1876 = vmatprep.subr.bf16.mxu0 %v5528_v33 }
 0x1d9   : > { %1877 = vmatpush1.bf16.msra.mxu0 %v5526_v35  ;;  %v1848_v35 = vand.u32 %v5555_v29, %v6197_v56 }
 0x1da   : > { %1878 = vmatprep.subr.bf16.mxu0 %v5533_v37  ;;  %v5558_v37 = vld [vmem:[#allocation4 + $0x754] ss:$12 sps:$4 sm:$0xff]  }
 0x1dd   : > { %1879 = vmatpush1.bf16.msra.mxu0 %v5531_v39 }
 0x1de   : > { %1880 = vmatprep.subr.bf16.mxu0 %v5538_v41  ;;  %v5559_v41 = vld [vmem:[#allocation4 + $0x768] ss:$12 sps:$4 sm:$0xff]  }
 0x1e1   : > { %1881 = vmatpush1.bf16.msra.mxu0 %v5536_v43  ;;  %v5567_v43 = vld [vmem:[#allocation4 + $0x79c] ss:$12 sps:$4 sm:$0xff]  }
 0x1e2   : > { %1891 = vmatprep.subr.bf16.mxu0 %v5543_v46  ;;  %v5570_v46 = vld [vmem:[#allocation4 + $0x7b4] ss:$12 sps:$4 sm:$0xff]  }
 0x267   : > { %v4986_v47 = vpop.f32.mrb[4].mxu0 }
 0x268   : > { %v4987_v48 = vpop.f32.mrb[5].mxu0 }
 0x269   : > { %v4988_v49 = vadd.f32 %v4987_v48, %v4986_v47  ;;  %v4989_v50 = vpop.f32.mrb[6].mxu0  ;;  %v5568_v47 = vld [vmem:[#allocation4 + $0x7b0] ss:$12 sps:$4 sm:$0xff]   ;;  %v5573_v48 = vld [vmem:[#allocation4 + $0x7cc] ss:$12 sps:$4 sm:$0xff]  }
 0x26a   : > { %v4990_v51 = vpop.f32.mrb[7].mxu0  ;;  %v5576_v50 = vld [vmem:[#allocation4 + $0x7e4] ss:$12 sps:$4 sm:$0xff]  }
 0x26b   : > { %v1375_v59 = vadd.f32 %v4988_v49, %v933_v54  ;;  %v5571_v49 = vld [vmem:[#allocation4 + $0x7c8] ss:$12 sps:$4 sm:$0xff]   ;;  %v5574_v51 = vld [vmem:[#allocation4 + $0x7e0] ss:$12 sps:$4 sm:$0xff]   ;;  %v5577_v54 = vld [vmem:[#allocation4 + $0x7f8] ss:$12 sps:$4 sm:$0xff]  }
 0x277   : > { %v1333_v60 = vpop.f32.mrb[8].mxu1  ;;  %v1414_v62 = vpop.f32.mrb[8].mxu0 }
 0x278   : > { %v5218_v63 = vadd.f32 %v1333_v60, %v925_v57  ;;  %v1415_v0 = vadd.f32 %v1414_v62, %v1375_v59  ;;  %v1335_v1 = vpop.f32.mrb[9].mxu1  ;;  %v5154_v3 = vpop.f32.mrb[9].mxu0  ;;  %v5582_v57 = vld [vmem:[#allocation4 + $0x814] ss:$12 sps:$4 sm:$0xff]   ;;  %v5585_v59 = vld [vmem:[#allocation4 + $0x82c] ss:$12 sps:$4 sm:$0xff]  }
 0x279   : > { %v5219_v4 = vadd.f32 %v1335_v1, %v929_v58  ;;  %v1337_v5 = vpop.f32.mrb[10].mxu1  ;;  %v1417_v6 = vpop.f32.mrb[10].mxu0  ;;  %v5580_v58 = vld [vmem:[#allocation4 + $0x810] ss:$12 sps:$4 sm:$0xff]   ;;  %v5583_v60 = vld [vmem:[#allocation4 + $0x828] ss:$12 sps:$4 sm:$0xff]  }
 0x27a   : > { %vm1420_vm7 = vcmp.gt.f32.partialorder %v5218_v63, 0.0  ;;  %v1423_v7 = vmul.f32 0.01, %v5218_v63  ;;  %v1338_v9 = vpop.f32.mrb[11].mxu1  ;;  %v5155_v10 = vpop.f32.mrb[11].mxu0  ;;  %vm1422_vm9 = vcmp.gt.f32.partialorder %v1415_v0, 0.0 }
 0x27b   : > { %vm1421_vm8 = vcmp.gt.f32.partialorder %v5219_v4, 0.0  ;;  %v1424_v8 = vmul.f32 0.01, %v5219_v4  ;;  %v1425_v25 = vmul.f32 0.01, %v1415_v0 }
 0x27c   : > { %v1426_v11 = vsel %vm1420_vm7, %v5218_v63, %v1423_v7  ;;  %v5588_v62 = vld [vmem:[#allocation4 + $0x844] ss:$12 sps:$4 sm:$0xff]   ;;  %v5586_v63 = vld [vmem:[#allocation4 + $0x840] ss:$12 sps:$4 sm:$0xff]   ;;  %v5601_v10 = vld [vmem:[#allocation4 + $0x888] ss:$12 sps:$4 sm:$0xff]  }
 0x27d   : > { %v6266_v12 = vadd.f32 %v1426_v11, %v6234_v30  ;;  %v1427_v13 = vsel %vm1421_vm8, %v5219_v4, %v1424_v8  ;;  %v5545_v30 = vld [vmem:[#allocation4 + $0x540] ss:$12 sps:$4 sm:$0xff]   ;;  %v1428_v33 = vsel %vm1422_vm9, %v1415_v0, %v1425_v25  ;;  %v5591_v0 = vld [vmem:[#allocation4 + $0x85c] ss:$12 sps:$4 sm:$0xff]   ;;  %v5589_v1 = vld [vmem:[#allocation4 + $0x858] ss:$12 sps:$4 sm:$0xff]  }
 0x27e   : > { %v6269_v16 = vadd.f32 %v1427_v13, %v6236_v31  ;;  %v5551_v31 = vld [vmem:[#allocation4 + $0x55c] ss:$12 sps:$4 sm:$0xff]   ;;  %v6284_v36 = vadd.f32 %v1428_v33, %v6254_v53  ;;  %v5564_v53 = vld [vmem:[#allocation4 + $0x784] ss:$12 sps:$4 sm:$0xff]   ;;  %v5594_v3 = vld [vmem:[#allocation4 + $0x8d4] ss:$12 sps:$4 sm:$0xff]  }
 0x27f   : > { %v1432_v20 = vpack.c.bf16 %v6266_v12, %v6266_v12  ;;  %v5592_v4 = vld [vmem:[#allocation4 + $0x8d0] ss:$12 sps:$4 sm:$0xff]   ;;  %v5597_v5 = vld [vmem:[#allocation4 + $0x874] ss:$12 sps:$4 sm:$0xff]   ;;  %v5600_v7 = vld [vmem:[#allocation4 + $0x8ec] ss:$12 sps:$4 sm:$0xff]  }
 0x280   : > { %v1433_v17 = vpack.c.bf16 %v6269_v16, %v6269_v16  ;;  %v1434_v39 = vpack.c.bf16 %v6284_v36, %v6284_v36  ;;  %v5595_v6 = vld [vmem:[#allocation4 + $0x870] ss:$12 sps:$4 sm:$0xff]   ;;  %v5598_v8 = vld [vmem:[#allocation4 + $0x8e8] ss:$12 sps:$4 sm:$0xff]   ;;  %v5603_v9 = vld [vmem:[#allocation4 + $0x88c] ss:$12 sps:$4 sm:$0xff]  }
 0x281   : > { %v5606_v11 = vld [vmem:[#allocation4 + $0x904] ss:$12 sps:$4 sm:$0xff]   ;;  %v5604_v13 = vld [vmem:[#allocation4 + $0x900] ss:$12 sps:$4 sm:$0xff]  }
 0x282   : > { %1882 = vmatprep.mubr.bf16.mxu0 %v1433_v17  ;;  %1964 = vmatprep.mubr.bf16.mxu1 %v1433_v17  ;;  %v5609_v17 = vld [vmem:[#allocation4 + $0x8a4] ss:$12 sps:$4 sm:$0xff]  }
 0x283   : > { %1883 = vmatmul.mubr.bf16.vlgmr.msra.gmra.mrb[12].mxu0 %v1432_v20  ;;  %1965 = vmatmul.mubr.bf16.vlgmr.msra.gmra.mrb[12].mxu1 %v1432_v20 }
 0x284   : > { %1892 = vmatpush1.bf16.msra.mxu0 %v5541_v18  ;;  %5157 = vmatpush3.bf16.msra.mxu1 %v5544_v19  ;;  %v2236_v18 = vld [vmem:[#allocation4 + $0x918] sm:$0x11]  ;;  %v5607_v19 = vld [vmem:[#allocation4 + $0x8a0] ss:$12 sps:$4 sm:$0xff]  }
 0x285   : > { %1893 = vmatprep.subr.bf16.mxu0 %v5547_v21  ;;  %5158 = vmatprep.subr.bf16.mxu1 %v6008_v45  ;;  %v4750_v20 = vcombine.low %v2236_v18, %v2236_v18  ;;  %v4751_v21 = vcombine.high %v2236_v18, %v2236_v18 }
 0x286   : > { %1923 = vmatprep.mubr.bf16.mxu0 %v6010_v55  ;;  %5164 = vmatprep.mubr.msk.bf16.mxu1 %vm6009_vm0, %v6008_v45 }
 0x288   : > { %1894 = vmatpush1.bf16.msra.mxu0 %v5545_v30  ;;  %5159 = vmatpush3.bf16.msra.mxu1 %v5548_v23  ;;  %v2557_v30 = vand.u32 %v4751_v21, %v6197_v56  ;;  %v5612_v23 = vld [vmem:[#allocation4 + $0x8b8] ss:$12 sps:$4 sm:$0xff]  }
 0x289   : > { %1895 = vmatprep.subr.bf16.mxu0 %v5551_v31  ;;  %5160 = vmatprep.subr.bf16.mxu1 %v6008_v45  ;;  %v2554_v31 = vand.u32 %v4750_v20, %v6197_v56 }
 0x28c   : > { %1896 = vmatpush1.bf16.msra.mxu0 %v5549_v26  ;;  %5161 = vmatpush3.bf16.msra.mxu1 %v5552_v27 }
 0x28d   : > { %1897 = vmatprep.subr.bf16.mxu0 %v1845_v32  ;;  %5162 = vmatprep.subr.bf16.mxu1 %v6008_v45  ;;  %v1516_v32 = vsub.s32 3, %v6209_v61 }
 0x28f   : > { %v1525_v33 = vrot.slane %v6211_v2, %v1516_v32 }
 0x290   : > { %1898 = vmatpush1.bf16.msra.mxu0 %v1842_v34  ;;  %5163 = vmatpush3.bf16.msra.mxu1 %v1848_v35  ;;  %v1517_v34 = vrot.slane %v6222_v14, %v1516_v32  ;;  %v1521_v35 = vrot.slane %v6224_v15, %v1516_v32 }
 0x291   : > { %2562 = vmatprep.subr.bf16.mxu1 %v5558_v37  ;;  %2603 = vmatprep.subr.bf16.mxu0 %v5594_v3 }
 0x293   : > { %4691 = vmatmul.mubr.msk.bf16.vlgmr.msra.gmra.mrb[12].mxu0 %vm653_vm2, %v1434_v39  ;;  %5165 = vmatmul.mubr.msk.bf16.vlgmr.msra.gmra.mrb[16].mxu1 %vm653_vm2, %v1434_v39 }
 0x294   : > { %2563 = vmatpush1.bf16.msra.mxu1 %v5556_v38  ;;  %2635 = vmatprep.mubr.bf16.mxu0 %v6010_v55 }
 0x295   : > { %2564 = vmatprep.subr.bf16.mxu1 %v5561_v40  ;;  %2604 = vmatpush1.bf16.msra.mxu0 %v5592_v4 }
 0x296   : > { %2605 = vmatprep.subr.bf16.mxu0 %v5600_v7 }
 0x298   : > { %2565 = vmatpush1.bf16.msra.mxu1 %v5559_v41 }
 0x299   : > { %2566 = vmatprep.subr.bf16.mxu1 %v5564_v53  ;;  %2606 = vmatpush1.bf16.msra.mxu0 %v5598_v8 }
 0x29a   : > { %2607 = vmatprep.subr.bf16.mxu0 %v5606_v11 }
 0x29c   : > { %2567 = vmatpush1.bf16.msra.mxu1 %v5562_v42 }
 0x29d   : > { %2568 = vmatprep.subr.bf16.mxu1 %v5567_v43  ;;  %2608 = vmatpush1.bf16.msra.mxu0 %v5604_v13 }
 0x29e   : > { %2609 = vmatprep.subr.bf16.mxu0 %v2557_v30 }
 0x2a0   : > { %2569 = vmatpush1.bf16.msra.mxu1 %v5565_v44 }
 0x2a1   : > { %2570 = vmatprep.subr.bf16.mxu1 %v5570_v46  ;;  %2610 = vmatpush1.bf16.msra.mxu0 %v2554_v31 }
 0x2a2   : > { %5024 = vmatprep.subr.bf16.mxu0 %v5615_v24 }
 0x2a4   : > { %2571 = vmatpush1.bf16.msra.mxu1 %v5568_v47 }
 0x2a5   : > { %2572 = vmatprep.subr.bf16.mxu1 %v5573_v48 }
 0x2a8   : > { %2573 = vmatpush1.bf16.msra.mxu1 %v5571_v49 }
 0x2a9   : > { %2574 = vmatprep.subr.bf16.mxu1 %v5576_v50 }
 0x2ac   : > { %2575 = vmatpush1.bf16.msra.mxu1 %v5574_v51 }
 0x2ad   : > { %2576 = vmatprep.subr.bf16.mxu1 %v5579_v52 }
 0x2b0   : > { %2577 = vmatpush1.bf16.msra.mxu1 %v5577_v54 }
 0x2b1   : > { %2578 = vmatprep.subr.bf16.mxu1 %v5582_v57 }
 0x2b4   : > { %2579 = vmatpush1.bf16.msra.mxu1 %v5580_v58 }
 0x2b5   : > { %2580 = vmatprep.subr.bf16.mxu1 %v5585_v59 }
 0x2b8   : > { %2581 = vmatpush1.bf16.msra.mxu1 %v5583_v60 }
 0x2b9   : > { %2582 = vmatprep.subr.bf16.mxu1 %v5588_v62 }
 0x2bc   : > { %2583 = vmatpush1.bf16.msra.mxu1 %v5586_v63 }
 0x2bd   : > { %2584 = vmatprep.subr.bf16.mxu1 %v5591_v0 }
 0x2c0   : > { %2585 = vmatpush1.bf16.msra.mxu1 %v5589_v1 }
 0x2c1   : > { %2586 = vmatprep.subr.bf16.mxu1 %v5597_v5 }
 0x2c4   : > { %2587 = vmatpush1.bf16.msra.mxu1 %v5595_v6 }
 0x2c5   : > { %2588 = vmatprep.subr.bf16.mxu1 %v5603_v9 }
 0x2c8   : > { %2589 = vmatpush1.bf16.msra.mxu1 %v5601_v10 }
 0x2c9   : > { %2590 = vmatprep.subr.bf16.mxu1 %v5609_v17 }
 0x2cc   : > { %2591 = vmatpush1.bf16.msra.mxu1 %v5607_v19 }
 0x2cd   : > { %2592 = vmatprep.subr.bf16.mxu1 %v5614_v22 }
 0x2d0   : > { %2593 = vmatpush1.bf16.msra.mxu1 %v5612_v23 }
 0x2d1   : > { %5168 = vmatprep.subr.bf16.mxu1 %v6008_v45 }
 0x356   : > { %v5013_v25 = vpop.f32.mrb[12].mxu1 }
 0x357   : > { %v5014_v26 = vpop.f32.mrb[13].mxu1 }
 0x358   : > { %v5015_v27 = vadd.f32 %v5014_v26, %v5013_v25  ;;  %v5016_v28 = vpop.f32.mrb[14].mxu1 }
 0x359   : > { %v5017_v29 = vpop.f32.mrb[15].mxu1 }
 0x35a   : > { %v1967_v37 = vadd.f32 %v5015_v27, %v1525_v33 }
 0x366   : > { %v1925_v38 = vpop.f32.mrb[12].mxu0  ;;  %v2006_v39 = vpop.f32.mrb[16].mxu1 }
 0x367   : > { %v5220_v40 = vadd.f32 %v1925_v38, %v1517_v34  ;;  %v2007_v41 = vadd.f32 %v2006_v39, %v1967_v37  ;;  %v1927_v53 = vpop.f32.mrb[13].mxu0  ;;  %v5166_v42 = vpop.f32.mrb[17].mxu1 }
 0x368   : > { %v5221_v43 = vadd.f32 %v1927_v53, %v1521_v35  ;;  %v1929_v44 = vpop.f32.mrb[14].mxu0  ;;  %v2009_v46 = vpop.f32.mrb[18].mxu1 }
 0x369   : > { %vm2012_vm10 = vcmp.gt.f32.partialorder %v5220_v40, 0.0  ;;  %v2015_v47 = vmul.f32 0.01, %v5220_v40  ;;  %vm2014_vm11 = vcmp.gt.f32.partialorder %v2007_v41, 0.0  ;;  %v2017_v48 = vmul.f32 0.01, %v2007_v41 }
 0x36a   : > { %vm2013_vm12 = vcmp.gt.f32.partialorder %v5221_v43, 0.0  ;;  %v2016_v2 = vmul.f32 0.01, %v5221_v43  ;;  %v1930_v49 = vpop.f32.mrb[15].mxu0  ;;  %v5167_v14 = vpop.f32.mrb[19].mxu1 }
 0x36b   : > { %v2018_v50 = vsel %vm2012_vm10, %v5220_v40, %v2015_v47  ;;  %v2020_v15 = vsel %vm2014_vm11, %v2007_v41, %v2017_v48  ;;  %v5617_v47 = vld [vmem:[#allocation4 + $0x8d8] ss:$12 sps:$4 sm:$0xff]   ;;  %v5618_v48 = vld [vmem:[#allocation4 + $0x830] ss:$12 sps:$4 sm:$0xff]   ;;  %v5621_v14 = vld [vmem:[#allocation4 + $0x848] ss:$12 sps:$4 sm:$0xff]  }
 0x36c   : > { %v2021_v51 = vadd.f32 %v2018_v50, %v6266_v12  ;;  %v2023_v52 = vadd.f32 %v2020_v15, %v6284_v36  ;;  %v2019_v54 = vsel %vm2013_vm12, %v5221_v43, %v2016_v2  ;;  %v5616_v43 = vld [vmem:[#allocation4 + $0x758] ss:$12 sps:$4 sm:$0xff]   ;;  %v5619_v49 = vld [vmem:[#allocation4 + $0x770] ss:$12 sps:$4 sm:$0xff]   ;;  %v5622_v15 = vld [vmem:[#allocation4 + $0x788] ss:$12 sps:$4 sm:$0xff]  }
 0x36d   : > { %v2022_v57 = vadd.f32 %v2019_v54, %v6269_v16  ;;  %v5620_v50 = vld [vmem:[#allocation4 + $0x8f0] ss:$12 sps:$4 sm:$0xff]   ;;  %v5626_v54 = vld [vmem:[#allocation4 + $0x920] ss:$0 sps:$4 sm:$0x11]  }
 0x36e   : > { %v2024_v58 = vrot.slane %v2021_v51, 4  ;;  %v2043_v59 = vsel %vm221_vm3, %v2021_v51, 0.0  ;;  %v2036_v60 = vsel %vm653_vm2, %v2023_v52, 0.0  ;;  %v2045_v62 = vsel %vm221_vm3, %v2023_v52, 0.0  ;;  %v5623_v52 = vld [vmem:[#allocation4 + $0x908] ss:$12 sps:$4 sm:$0xff]  }
 0x36f   : > { %v2046_v63 = vrot.slane %v2043_v59, 4  ;;  %v2037_v0 = vrot.slane %v2036_v60, 4  ;;  %v2058_v1 = vsel %vm653_vm2, %v2045_v62, 0.0  ;;  %v2030_v3 = vrot.slane %v2022_v57, 4  ;;  %v5628_v62 = vld [vmem:[#allocation4 + $0x7b8] ss:$12 sps:$4 sm:$0xff]  }
 0x370   : > { %v2025_v12 = vadd.f32 %v2024_v58, %v2021_v51  ;;  %v2059_v4 = vrot.slane %v2058_v1, 4  ;;  %v2044_v36 = vsel %vm221_vm3, %v2022_v57, 0.0  ;;  %v5624_v51 = vld [vmem:[#allocation4 + $0x860] ss:$12 sps:$4 sm:$0xff]   ;;  %v5627_v58 = vld [vmem:[#allocation4 + $0x878] ss:$12 sps:$4 sm:$0xff]  }
 0x371   : > { %v2047_v16 = vadd.f32 %v2046_v63, %v2043_v59  ;;  %v2038_v5 = vadd.f32 %v2037_v0, %v2036_v60  ;;  %v2031_v6 = vadd.f32 %v2030_v3, %v2022_v57  ;;  %v2052_v7 = vrot.slane %v2044_v36, 4  ;;  %v5625_v57 = vld [vmem:[#allocation4 + $0x7a0] ss:$12 sps:$4 sm:$0xff]   ;;  %v5632_v63 = vld [vmem:[#allocation4 + $0x890] ss:$12 sps:$4 sm:$0xff]  }
 0x372   : > { %v2026_v8 = vrot.slane %v2025_v12, 2  ;;  %v2060_v9 = vadd.f32 %v2059_v4, %v2058_v1  ;;  %v2560_v59 = vand.u32 %v5626_v54, %v6197_v56  ;;  %v5631_v60 = vld [vmem:[#allocation4 + $0x700] ss:$12 sps:$4 sm:$0xff]   ;;  %v5629_v0 = vld [vmem:[#allocation4 + $0x6fc] ss:$12 sps:$4 sm:$0xff]  }
 0x373   : > { %v2048_v10 = vrot.slane %v2047_v16, 2  ;;  %v2039_v11 = vrot.slane %v2038_v5, 2  ;;  %v2032_v13 = vrot.slane %v2031_v6, 2  ;;  %v2053_v17 = vadd.f32 %v2052_v7, %v2044_v36  ;;  %v5636_v1 = vld [vmem:[#allocation4 + $0x718] ss:$12 sps:$4 sm:$0xff]  }
 0x374   : > { %v2061_v18 = vrot.slane %v2060_v9, 2  ;;  %v2027_v19 = vadd.f32 %v2026_v8, %v2025_v12  ;;  %v5633_v3 = vld [vmem:[#allocation4 + $0x7d0] ss:$12 sps:$4 sm:$0xff]   ;;  %v2154_v12 = vld [vmem:[#allocation4 + $0x744] sm:$0x11] }
 0x375   : > { %v2040_v20 = vadd.f32 %v2039_v11, %v2038_v5  ;;  %v2033_v21 = vadd.f32 %v2032_v13, %v2031_v6  ;;  %v2054_v22 = vrot.slane %v2053_v17, 2  ;;  %v2049_v30 = vadd.f32 %v2048_v10, %v2047_v16  ;;  %v5637_v4 = vld [vmem:[#allocation4 + $0x8a8] ss:$12 sps:$4 sm:$0xff]   ;;  %v5641_v16 = vld [vmem:[#allocation4 + $0x730] ss:$12 sps:$4 sm:$0xff]  }
 0x376   : > { %v2062_v23 = vadd.f32 %v2061_v18, %v2060_v9  ;;  %v2028_v31 = vrot.slane %v2027_v19, 1  ;;  %v5634_v36 = vld [vmem:[#allocation4 + $0x714] ss:$12 sps:$4 sm:$0xff]   ;;  %v4813_v5 = vcombine.high %v2154_v12, %v2154_v12  ;;  %v5639_v8 = vld [vmem:[#allocation4 + $0x72c] ss:$12 sps:$4 sm:$0xff]   ;;  %v4812_v9 = vcombine.low %v2154_v12, %v2154_v12 }
 0x377   : > { %v2041_v61 = vrot.slane %v2040_v20, 1  ;;  %v2034_v24 = vrot.slane %v2033_v21, 1  ;;  %v2055_v25 = vadd.f32 %v2054_v22, %v2053_v17  ;;  %v2050_v26 = vrot.slane %v2049_v30, 1  ;;  %v5638_v6 = vld [vmem:[#allocation4 + $0x7e8] ss:$12 sps:$4 sm:$0xff]  }
 0x378   : > { %v2063_v27 = vrot.slane %v2062_v23, 1  ;;  %v2029_v28 = vadd.f32 %v2028_v31, %v2027_v19  ;;  %v5642_v7 = vld [vmem:[#allocation4 + $0x8c0] ss:$12 sps:$4 sm:$0xff]   ;;  %v3043_v10 = vand.u32 %v4813_v5, %v6197_v56  ;;  %v3040_v17 = vand.u32 %v4812_v9, %v6197_v56  ;;  %v5653_v22 = vld [vmem:[#allocation4 + $0x598] ss:$12 sps:$4 sm:$0xff]  }
 0x379   : > { %v2042_v29 = vadd.f32 %v2041_v61, %v2040_v20  ;;  %v2035_v32 = vadd.f32 %v2034_v24, %v2033_v21  ;;  %v2056_v33 = vrot.slane %v2055_v25, 1  ;;  %v6310_v34 = vadd.f32 %v2050_v26, %v2049_v30  ;;  %v5643_v11 = vld [vmem:[#allocation4 + $0x800] ss:$12 sps:$4 sm:$0xff]   ;;  %v5649_v20 = vld [vmem:[#allocation4 + $0x644] ss:$12 sps:$4 sm:$0xff]  }
 0x37a   : > { %v6312_v35 = vadd.f32 %v2063_v27, %v2062_v23  ;;  %v5648_v13 = vld [vmem:[#allocation4 + $0x580] ss:$12 sps:$4 sm:$0xff]   ;;  %v5646_v21 = vld [vmem:[#allocation4 + $0x57c] ss:$12 sps:$4 sm:$0xff]   ;;  %v5650_v23 = vld [vmem:[#allocation4 + $0x584] ss:$12 sps:$4 sm:$0xff]  }
 0x37b   : > { %v6314_v37 = vadd.f32 %v2056_v33, %v2055_v25  ;;  %v2068_v38 = vsub.f32 %v2029_v28, %v6310_v34  ;;  %v5654_v61 = vld [vmem:[#allocation4 + $0x65c] ss:$12 sps:$4 sm:$0xff]   ;;  %v5651_v24 = vld [vmem:[#allocation4 + $0x594] ss:$12 sps:$4 sm:$0xff]   ;;  %v5656_v28 = vld [vmem:[#allocation4 + $0x5ac] ss:$12 sps:$4 sm:$0xff]  }
 0x37c   : > { %v2070_v39 = vsub.f32 %v2042_v29, %v6312_v35  ;;  %v2067_v19 = vmul.f32 0.25, %v6312_v35  ;;  %v5658_v25 = vld [vmem:[#allocation4 + $0x5b0] ss:$12 sps:$4 sm:$0xff]   ;;  %v5659_v27 = vld [vmem:[#allocation4 + $0x674] ss:$12 sps:$4 sm:$0xff]  }
 0x37d   : > { %v2069_v40 = vsub.f32 %v2035_v32, %v6314_v37  ;;  %v2071_v53 = vmul.f32 0.25, %v2068_v38  ;;  %v2066_v18 = vmul.f32 0.25, %v6314_v37  ;;  %v5655_v26 = vld [vmem:[#allocation4 + $0x59c] ss:$12 sps:$4 sm:$0xff]   ;;  %v5660_v32 = vld [vmem:[#allocation4 + $0x5b4] ss:$12 sps:$4 sm:$0xff]  }
 0x37e   : > { %v2073_v41 = vmul.f32 0.25, %v2070_v39  ;;  %v6336_v31 = vpack.c.bf16 %v2067_v19, %v2067_v19  ;;  %v5663_v29 = vld [vmem:[#allocation4 + $0x5c8] ss:$12 sps:$4 sm:$0xff]   ;;  %v5664_v33 = vld [vmem:[#allocation4 + $0x68c] ss:$12 sps:$4 sm:$0xff]  }
 0x37f   : > { %v2072_v42 = vmul.f32 0.25, %v2069_v40  ;;  %v6320_v2 = vpack.c.bf16 %v2071_v53, %v2071_v53  ;;  %v2075_v30 = vpack.c.bf16 %v2066_v18, %v2066_v18  ;;  %v5661_v35 = vld [vmem:[#allocation4 + $0x5c4] ss:$12 sps:$4 sm:$0xff]   ;;  %v5668_v37 = vld [vmem:[#allocation4 + $0x5e0] ss:$12 sps:$4 sm:$0xff]  }
 0x380   : > { %v2158_v44 = vpack.c.bf16 %v2073_v41, %v2073_v41  ;;  %v5665_v38 = vld [vmem:[#allocation4 + $0x5cc] ss:$12 sps:$4 sm:$0xff]   ;;  %v5669_v39 = vld [vmem:[#allocation4 + $0x6a4] ss:$12 sps:$4 sm:$0xff]   ;;  %v5666_v40 = vld [vmem:[#allocation4 + $0x5dc] ss:$12 sps:$4 sm:$0xff]  }
 0x381   : > { %v2157_v46 = vpack.c.bf16 %v2072_v42, %v2072_v42  ;;  %v5673_v41 = vld [vmem:[#allocation4 + $0x5f8] ss:$12 sps:$4 sm:$0xff]   ;;  %v5674_v42 = vld [vmem:[#allocation4 + $0x6bc] ss:$12 sps:$4 sm:$0xff]  }
 0x382   : > { %4753 = vmatmul.mubr.msk.bf16.vlgmr.msra.gmra.mrb[16].mxu0 %vm653_vm2, %v2158_v44  ;;  %v5670_v53 = vld [vmem:[#allocation4 + $0x5e4] ss:$12 sps:$4 sm:$0xff]   ;;  %v5686_v54 = vld [vmem:[#allocation4 + $0x63c] ss:$12 sps:$4 sm:$0xff]  }
 0x383   : > { %2594 = vmatprep.mubr.bf16.mxu1 %v2157_v46  ;;  %5025 = vmatpush3.bf16.msra.mxu0 %v5616_v43  ;;  %v5671_v43 = vld [vmem:[#allocation4 + $0x5f4] ss:$12 sps:$4 sm:$0xff]   ;;  %v5698_v12 = vld [vmem:[#allocation4 + $0x684] ss:$12 sps:$4 sm:$0xff]   ;;  %v5717_v18 = vld [vmem:[#allocation4 + $0x93c] ss:$12 sps:$4 sm:$0xff]  }
 0x384   : > { %2595 = vmatmul.mubr.bf16.vlgmr.msra.gmra.mrb[20].mxu1 %v6320_v2  ;;  %2676 = vmatprep.mubr.bf16.mxu0 %v2157_v46  ;;  %v5675_v46 = vld [vmem:[#allocation4 + $0x5fc] ss:$12 sps:$4 sm:$0xff]   ;;  %v5707_v5 = vld [vmem:[#allocation4 + $0x6b8] ss:$12 sps:$4 sm:$0xff]  }
 0x385   : > { %5169 = vmatpush3.bf16.msra.mxu1 %v5617_v47  ;;  %5026 = vmatprep.subr.bf16.mxu0 %v5618_v48  ;;  %v5679_v47 = vld [vmem:[#allocation4 + $0x6d4] ss:$12 sps:$4 sm:$0xff]   ;;  %v5676_v48 = vld [vmem:[#allocation4 + $0x60c] ss:$12 sps:$4 sm:$0xff]  }
 0x386   : > { %5170 = vmatprep.subr.bf16.mxu1 %v6008_v45  ;;  %5176 = vmatprep.mubr.msk.bf16.mxu1 %vm6009_vm0, %v6008_v45  ;;  %v5713_v9 = vld [vmem:[#allocation4 + $0x6e8] ss:$12 sps:$4 sm:$0xff]   ;;  %v5722_v19 = vld [vmem:[#allocation4 + $0x958] ss:$12 sps:$4 sm:$0xff]  }
 0x387   : > { %5027 = vmatpush3.bf16.msra.mxu0 %v5619_v49  ;;  %v5680_v49 = vld [vmem:[#allocation4 + $0x614] ss:$12 sps:$4 sm:$0xff]  }
 0x388   : > { %5028 = vmatprep.subr.bf16.mxu0 %v5621_v14  ;;  %v5684_v14 = vld [vmem:[#allocation4 + $0x6ec] ss:$12 sps:$4 sm:$0xff]  }
 0x389   : > { %5171 = vmatpush3.bf16.msra.mxu1 %v5620_v50  ;;  %v5681_v50 = vld [vmem:[#allocation4 + $0x624] ss:$12 sps:$4 sm:$0xff]  }
 0x38a   : > { %5172 = vmatprep.subr.bf16.mxu1 %v6008_v45 }
 0x38b   : > { %5029 = vmatpush3.bf16.msra.mxu0 %v5622_v15  ;;  %v5688_v15 = vld [vmem:[#allocation4 + $0x640] ss:$12 sps:$4 sm:$0xff]  }
 0x38c   : > { %5030 = vmatprep.subr.bf16.mxu0 %v5624_v51  ;;  %v5685_v51 = vld [vmem:[#allocation4 + $0x62c] ss:$12 sps:$4 sm:$0xff]  }
 0x38d   : > { %5173 = vmatpush3.bf16.msra.mxu1 %v5623_v52  ;;  %v2065_v52 = vmul.f32 0.25, %v6310_v34  ;;  %v5694_v34 = vld [vmem:[#allocation4 + $0x66c] ss:$12 sps:$4 sm:$0xff]  }
 0x38e   : > { %5174 = vmatprep.subr.bf16.mxu1 %v6008_v45 }
 0x38f   : > { %5031 = vmatpush3.bf16.msra.mxu0 %v5625_v57  ;;  %v5692_v57 = vld [vmem:[#allocation4 + $0x658] ss:$12 sps:$4 sm:$0xff]  }
 0x390   : > { %5032 = vmatprep.subr.bf16.mxu0 %v5627_v58  ;;  %v5689_v58 = vld [vmem:[#allocation4 + $0x704] ss:$12 sps:$4 sm:$0xff]  }
 0x391   : > { %5175 = vmatpush3.bf16.msra.mxu1 %v2560_v59  ;;  %v2074_v59 = vpack.c.bf16 %v2065_v52, %v2065_v52  ;;  %v5767_v52 = vld [vmem:[#allocation4 + $0x9a4] ss:$12 sps:$4 sm:$0xff]  }
 0x392   : > { %3089 = vmatprep.subr.bf16.mxu1 %v5631_v60  ;;  %v5690_v60 = vld [vmem:[#allocation4 + $0x654] ss:$12 sps:$4 sm:$0xff]  }
 0x393   : > { %5033 = vmatpush3.bf16.msra.mxu0 %v5628_v62  ;;  %v5696_v62 = vld [vmem:[#allocation4 + $0x670] ss:$12 sps:$4 sm:$0xff]  }
 0x394   : > { %5177 = vmatmul.mubr.msk.bf16.vlgmr.msra.gmra.mrb[24].mxu1 %vm653_vm2, %v2158_v44  ;;  %5034 = vmatprep.subr.bf16.mxu0 %v5632_v63  ;;  %v5678_v44 = vld [vmem:[#allocation4 + $0x610] ss:$12 sps:$4 sm:$0xff]  }
 0x395   : > { %3090 = vmatpush1.bf16.msra.mxu1 %v5629_v0  ;;  %3121 = vmatprep.mubr.bf16.mxu1 %v6010_v55  ;;  %v5693_v63 = vld [vmem:[#allocation4 + $0x71c] ss:$12 sps:$4 sm:$0xff]  }
 0x396   : > { %3091 = vmatprep.subr.bf16.mxu1 %v5636_v1  ;;  %v5700_v0 = vld [vmem:[#allocation4 + $0x688] ss:$12 sps:$4 sm:$0xff]  }
 0x397   : > { %5035 = vmatpush3.bf16.msra.mxu0 %v5633_v3  ;;  %v5697_v1 = vld [vmem:[#allocation4 + $0x734] ss:$12 sps:$4 sm:$0xff]   ;;  %v5701_v3 = vld [vmem:[#allocation4 + $0x74c] ss:$0 sps:$4 sm:$0x11]  }
 0x398   : > { %5036 = vmatprep.subr.bf16.mxu0 %v5637_v4  ;;  %v5704_v4 = vld [vmem:[#allocation4 + $0x6a0] ss:$12 sps:$4 sm:$0xff]  }
 0x399   : > { %3092 = vmatpush1.bf16.msra.mxu1 %v5634_v36  ;;  %v3046_v36 = vand.u32 %v5701_v3, %v6197_v56 }
 0x39a   : > { %3093 = vmatprep.subr.bf16.mxu1 %v5641_v16  ;;  %v5702_v16 = vld [vmem:[#allocation4 + $0x69c] ss:$12 sps:$4 sm:$0xff]  }
 0x39b   : > { %5037 = vmatpush3.bf16.msra.mxu0 %v5638_v6  ;;  %v5705_v6 = vld [vmem:[#allocation4 + $0x6b4] ss:$12 sps:$4 sm:$0xff]  }
 0x39c   : > { %5038 = vmatprep.subr.bf16.mxu0 %v5642_v7  ;;  %v5710_v7 = vld [vmem:[#allocation4 + $0x6d0] ss:$12 sps:$4 sm:$0xff]  }
 0x39d   : > { %3094 = vmatpush1.bf16.msra.mxu1 %v5639_v8  ;;  %v5708_v8 = vld [vmem:[#allocation4 + $0x6cc] ss:$12 sps:$4 sm:$0xff]  }
 0x39e   : > { %3095 = vmatprep.subr.bf16.mxu1 %v3043_v10  ;;  %v5711_v10 = vld [vmem:[#allocation4 + $0x6e4] ss:$12 sps:$4 sm:$0xff]  }
 0x39f   : > { %5039 = vmatpush3.bf16.msra.mxu0 %v5643_v11  ;;  %v5714_v11 = vld [vmem:[#allocation4 + $0x924] ss:$12 sps:$4 sm:$0xff]  }
 0x3a0   : > { %3048 = vmatprep.subr.bf16.mxu0 %v5648_v13  ;;  %v5716_v13 = vld [vmem:[#allocation4 + $0x928] ss:$12 sps:$4 sm:$0xff]  }
 0x3a1   : > { %3096 = vmatpush1.bf16.msra.mxu1 %v3040_v17  ;;  %v5719_v17 = vld [vmem:[#allocation4 + $0x940] ss:$12 sps:$4 sm:$0xff]  }
 0x3a2   : > { %2677 = vmatmul.mubr.bf16.vlgmr.msra.gmra.mrb[20].mxu0 %v6320_v2  ;;  %5051 = vmatprep.subr.bf16.mxu1 %v5649_v20  ;;  %v5683_v2 = vld [vmem:[#allocation4 + $0x628] ss:$12 sps:$4 sm:$0xff]  }
 0x3a3   : > { %3049 = vmatpush1.bf16.msra.mxu0 %v5646_v21  ;;  %3080 = vmatprep.mubr.bf16.mxu0 %v2075_v30  ;;  %v5720_v20 = vld [vmem:[#allocation4 + $0x954] ss:$12 sps:$4 sm:$0xff]   ;;  %v5725_v21 = vld [vmem:[#allocation4 + $0x970] ss:$12 sps:$4 sm:$0xff]  }
 0x3a4   : > { %4815 = vmatmul.mubr.msk.bf16.vlgmr.msra.gmra.mrb[28].mxu1 %vm653_vm2, %v6336_v31  ;;  %3050 = vmatprep.subr.bf16.mxu0 %v5653_v22  ;;  %v5723_v22 = vld [vmem:[#allocation4 + $0x96c] ss:$12 sps:$4 sm:$0xff]  }
 0x3a5   : > { %5052 = vmatpush3.bf16.msra.mxu1 %v5650_v23  ;;  %3162 = vmatprep.mubr.bf16.mxu1 %v2075_v30  ;;  %v5728_v30 = vld [vmem:[#allocation4 + $0x988] ss:$12 sps:$4 sm:$0xff]   ;;  %v5726_v23 = vld [vmem:[#allocation4 + $0x984] ss:$12 sps:$4 sm:$0xff]  }
 0x3a6   : > { %5053 = vmatprep.subr.bf16.mxu1 %v5654_v61  ;;  %v5729_v61 = vld [vmem:[#allocation4 + $0x99c] ss:$12 sps:$4 sm:$0xff]  }
 0x3a7   : > { %3051 = vmatpush1.bf16.msra.mxu0 %v5651_v24  ;;  %v5734_v24 = vld [vmem:[#allocation4 + $0x9b8] ss:$12 sps:$4 sm:$0xff]  }
 0x3a8   : > { %3052 = vmatprep.subr.bf16.mxu0 %v5658_v25  ;;  %v5732_v25 = vld [vmem:[#allocation4 + $0x9b4] ss:$12 sps:$4 sm:$0xff]  }
 0x3a9   : > { %5054 = vmatpush3.bf16.msra.mxu1 %v5655_v26  ;;  %v5735_v26 = vld [vmem:[#allocation4 + $0x9cc] ss:$12 sps:$4 sm:$0xff]  }
 0x3aa   : > { %5055 = vmatprep.subr.bf16.mxu1 %v5659_v27  ;;  %v5737_v27 = vld [vmem:[#allocation4 + $0x9d0] ss:$12 sps:$4 sm:$0xff]  }
 0x3ab   : > { %3053 = vmatpush1.bf16.msra.mxu0 %v5656_v28  ;;  %v5740_v28 = vld [vmem:[#allocation4 + $0x9e8] ss:$12 sps:$4 sm:$0xff]  }
 0x3ac   : > { %3054 = vmatprep.subr.bf16.mxu0 %v5663_v29  ;;  %v5741_v29 = vld [vmem:[#allocation4 + $0x9ec] ss:$12 sps:$4 sm:$0xff]  }
 0x3ad   : > { %5056 = vmatpush3.bf16.msra.mxu1 %v5660_v32  ;;  %v5742_v32 = vld [vmem:[#allocation4 + $0x92c] ss:$12 sps:$4 sm:$0xff]  }
 0x3ae   : > { %5057 = vmatprep.subr.bf16.mxu1 %v5664_v33  ;;  %v5746_v33 = vld [vmem:[#allocation4 + $0xa04] ss:$12 sps:$4 sm:$0xff]  }
 0x3af   : > { %3055 = vmatpush1.bf16.msra.mxu0 %v5661_v35  ;;  %v5738_v35 = vld [vmem:[#allocation4 + $0x9e4] ss:$12 sps:$4 sm:$0xff]  }
 0x3b0   : > { %3056 = vmatprep.subr.bf16.mxu0 %v5668_v37  ;;  %v5745_v37 = vld [vmem:[#allocation4 + $0xa00] ss:$12 sps:$4 sm:$0xff]  }
 0x3b1   : > { %5058 = vmatpush3.bf16.msra.mxu1 %v5665_v38  ;;  %v5747_v38 = vld [vmem:[#allocation4 + $0x944] ss:$12 sps:$4 sm:$0xff]  }
 0x3b2   : > { %5059 = vmatprep.subr.bf16.mxu1 %v5669_v39  ;;  %v5743_v39 = vld [vmem:[#allocation4 + $0x9fc] ss:$12 sps:$4 sm:$0xff]  }
 0x3b3   : > { %3057 = vmatpush1.bf16.msra.mxu0 %v5666_v40  ;;  %v5750_v40 = vld [vmem:[#allocation4 + $0xa18] ss:$12 sps:$4 sm:$0xff]  }
 0x3b4   : > { %3058 = vmatprep.subr.bf16.mxu0 %v5673_v41  ;;  %v5751_v41 = vld [vmem:[#allocation4 + $0xa1c] ss:$12 sps:$4 sm:$0xff]  }
 0x3b5   : > { %5060 = vmatpush3.bf16.msra.mxu1 %v5670_v53  ;;  %v5748_v53 = vld [vmem:[#allocation4 + $0xa14] ss:$12 sps:$4 sm:$0xff]  }
 0x3b6   : > { %5061 = vmatprep.subr.bf16.mxu1 %v5674_v42  ;;  %v5752_v42 = vld [vmem:[#allocation4 + $0x95c] ss:$12 sps:$4 sm:$0xff]  }
 0x3b7   : > { %3059 = vmatpush1.bf16.msra.mxu0 %v5671_v43  ;;  %v5755_v43 = vld [vmem:[#allocation4 + $0xa30] ss:$12 sps:$4 sm:$0xff]  }
 0x3b8   : > { %3060 = vmatprep.subr.bf16.mxu0 %v5678_v44  ;;  %v5756_v44 = vld [vmem:[#allocation4 + $0xa34] ss:$12 sps:$4 sm:$0xff]  }
 0x3b9   : > { %5062 = vmatpush3.bf16.msra.mxu1 %v5675_v46  ;;  %v5753_v46 = vld [vmem:[#allocation4 + $0xa2c] ss:$12 sps:$4 sm:$0xff]  }
 0x3ba   : > { %5063 = vmatprep.subr.bf16.mxu1 %v5679_v47  ;;  %v5757_v47 = vld [vmem:[#allocation4 + $0x974] ss:$12 sps:$4 sm:$0xff]  }
 0x3bb   : > { %3061 = vmatpush1.bf16.msra.mxu0 %v5676_v48  ;;  %v5760_v48 = vld [vmem:[#allocation4 + $0xa48] ss:$12 sps:$4 sm:$0xff]  }
 0x3bc   : > { %3062 = vmatprep.subr.bf16.mxu0 %v5683_v2  ;;  %v5761_v2 = vld [vmem:[#allocation4 + $0xa4c] ss:$12 sps:$4 sm:$0xff]  }
 0x3bd   : > { %5064 = vmatpush3.bf16.msra.mxu1 %v5680_v49  ;;  %v5758_v49 = vld [vmem:[#allocation4 + $0xa44] ss:$12 sps:$4 sm:$0xff]  }
 0x3be   : > { %5065 = vmatprep.subr.bf16.mxu1 %v5684_v14  ;;  %v5762_v14 = vld [vmem:[#allocation4 + $0x98c] ss:$12 sps:$4 sm:$0xff]  }
 0x3bf   : > { %3063 = vmatpush1.bf16.msra.mxu0 %v5681_v50  ;;  %v5765_v50 = vld [vmem:[#allocation4 + $0xa60] ss:$12 sps:$4 sm:$0xff]  }
 0x3c0   : > { %3064 = vmatprep.subr.bf16.mxu0 %v5688_v15  ;;  %v5766_v15 = vld [vmem:[#allocation4 + $0xa64] ss:$12 sps:$4 sm:$0xff]  }
 0x3c1   : > { %5066 = vmatpush3.bf16.msra.mxu1 %v5685_v51  ;;  %v5763_v51 = vld [vmem:[#allocation4 + $0xa5c] ss:$12 sps:$4 sm:$0xff]  }
 0x3c2   : > { %5180 = vmatprep.subr.bf16.mxu1 %v6008_v45 }
 0x3c3   : > { %3065 = vmatpush1.bf16.msra.mxu0 %v5686_v54  ;;  %v5770_v54 = vld [vmem:[#allocation4 + $0xa78] ss:$12 sps:$4 sm:$0xff]  }
 0x3c4   : > { %3163 = vmatmul.mubr.bf16.vlgmr.msra.gmra.mrb[32].mxu1 %v2074_v59  ;;  %3066 = vmatprep.subr.bf16.mxu0 %v5692_v57  ;;  %v5771_v57 = vld [vmem:[#allocation4 + $0xa7c] ss:$12 sps:$4 sm:$0xff]  }
 0x3c5   : > { %5181 = vmatpush3.bf16.msra.mxu1 %v5689_v58  ;;  %5188 = vmatprep.mubr.msk.bf16.mxu1 %vm6009_vm0, %v6008_v45  ;;  %v5768_v58 = vld [vmem:[#allocation4 + $0xa74] ss:$12 sps:$4 sm:$0xff]  }
 0x3c6   : > { %5182 = vmatprep.subr.bf16.mxu1 %v6008_v45 }
 0x3c7   : > { %3067 = vmatpush1.bf16.msra.mxu0 %v5690_v60  ;;  %v5775_v60 = vld [vmem:[#allocation4 + $0xa90] ss:$12 sps:$4 sm:$0xff]  }
 0x3c8   : > { %3068 = vmatprep.subr.bf16.mxu0 %v5696_v62  ;;  %v5776_v62 = vld [vmem:[#allocation4 + $0xa94] ss:$12 sps:$4 sm:$0xff]  }
 0x3c9   : > { %5183 = vmatpush3.bf16.msra.mxu1 %v5693_v63  ;;  %v5773_v63 = vld [vmem:[#allocation4 + $0xa8c] ss:$12 sps:$4 sm:$0xff]  }
 0x3ca   : > { %5184 = vmatprep.subr.bf16.mxu1 %v6008_v45 }
 0x3cb   : > { %3069 = vmatpush1.bf16.msra.mxu0 %v5694_v34  ;;  %v5777_v34 = vld [vmem:[#allocation4 + $0x9d4] ss:$12 sps:$4 sm:$0xff]  }
 0x3cc   : > { %3070 = vmatprep.subr.bf16.mxu0 %v5700_v0  ;;  %v5780_v0 = vld [vmem:[#allocation4 + $0xaa8] ss:$12 sps:$4 sm:$0xff]  }
 0x3cd   : > { %5185 = vmatpush3.bf16.msra.mxu1 %v5697_v1 }
 0x3ce   : > { %5186 = vmatprep.subr.bf16.mxu1 %v6008_v45 }
 0x3cf   : > { %3071 = vmatpush1.bf16.msra.mxu0 %v5698_v12 }
 0x3d0   : > { %3072 = vmatprep.subr.bf16.mxu0 %v5704_v4 }
 0x3d1   : > { %5187 = vmatpush3.bf16.msra.mxu1 %v3046_v36 }
 0x3d2   : > { %5078 = vmatprep.subr.bf16.mxu1 %v5741_v29 }
 0x3d3   : > { %3073 = vmatpush1.bf16.msra.mxu0 %v5702_v16 }
 0x3d4   : > { %5189 = vmatmul.mubr.msk.bf16.vlgmr.msra.gmra.mrb[36].mxu1 %vm653_vm2, %v6336_v31  ;;  %3074 = vmatprep.subr.bf16.mxu0 %v5707_v5  ;;  %v5731_v31 = vld [vmem:[#allocation4 + $0x9a0] ss:$12 sps:$4 sm:$0xff]  }
 0x3d5   : > { %5079 = vmatpush3.bf16.msra.mxu1 %v5742_v32 }
 0x3d6   : > { %5080 = vmatprep.subr.bf16.mxu1 %v5746_v33 }
 0x3d7   : > { %3075 = vmatpush1.bf16.msra.mxu0 %v5705_v6 }
 0x3d8   : > { %3076 = vmatprep.subr.bf16.mxu0 %v5710_v7 }
 0x3d9   : > { %5081 = vmatpush3.bf16.msra.mxu1 %v5747_v38 }
 0x3da   : > { %5082 = vmatprep.subr.bf16.mxu1 %v5751_v41  ;;  %v6351_v41 = vld [vmem:[#allocation6] sm:$0xff] }
 0x3db   : > { %3077 = vmatpush1.bf16.msra.mxu0 %v5708_v8 }
 0x3dc   : > { %3078 = vmatprep.subr.bf16.mxu0 %v5713_v9 }
 0x3dd   : > { %5083 = vmatpush3.bf16.msra.mxu1 %v5752_v42 }
 0x3de   : > { %5084 = vmatprep.subr.bf16.mxu1 %v5756_v44  ;;  %v6354_v44 = vld [vmem:[#allocation6 + $0x8] sm:$0xff] }
 0x3df   : > { %3079 = vmatpush1.bf16.msra.mxu0 %v5711_v10 }
 0x3e0   : > { %3634 = vmatprep.subr.bf16.mxu0 %v5716_v13 }
 0x3e1   : > { %5085 = vmatpush3.bf16.msra.mxu1 %v5757_v47 }
 0x3e2   : > { %3081 = vmatmul.mubr.bf16.vlgmr.msra.gmra.mrb[24].mxu0 %v2074_v59  ;;  %5086 = vmatprep.subr.bf16.mxu1 %v5761_v2  ;;  %v5772_v59 = vld [vmem:[#allocation4 + $0x9bc] ss:$12 sps:$4 sm:$0xff]  }
 0x3e3   : > { %3635 = vmatpush1.bf16.msra.mxu0 %v5714_v11 }
 0x3e4   : > { %3636 = vmatprep.subr.bf16.mxu0 %v5719_v17 }
 0x3e5   : > { %5087 = vmatpush3.bf16.msra.mxu1 %v5762_v14 }
 0x3e6   : > { %5088 = vmatprep.subr.bf16.mxu1 %v5766_v15 }
 0x3e7   : > { %3637 = vmatpush1.bf16.msra.mxu0 %v5717_v18 }
 0x3e8   : > { %3638 = vmatprep.subr.bf16.mxu0 %v5722_v19 }
 0x3e9   : > { %5089 = vmatpush3.bf16.msra.mxu1 %v5767_v52  ;;  %v5781_v52 = vld [vmem:[#allocation4 + $0xaac] ss:$12 sps:$4 sm:$0xff]  }
 0x3ea   : > { %5090 = vmatprep.subr.bf16.mxu1 %v5771_v57  ;;  %v5784_v57 = vld [vmem:[#allocation4 + $0xac0] ss:$12 sps:$4 sm:$0xff]  }
 0x3eb   : > { %3639 = vmatpush1.bf16.msra.mxu0 %v5720_v20 }
 0x3ec   : > { %3640 = vmatprep.subr.bf16.mxu0 %v5725_v21 }
 0x3ed   : > { %5091 = vmatpush3.bf16.msra.mxu1 %v5772_v59  ;;  %v5782_v59 = vld [vmem:[#allocation4 + $0xabc] ss:$12 sps:$4 sm:$0xff]  }
 0x3ee   : > { %5092 = vmatprep.subr.bf16.mxu1 %v5776_v62  ;;  %v5788_v62 = vld [vmem:[#allocation4 + $0xad8] ss:$12 sps:$4 sm:$0xff]  }
 0x3ef   : > { %3641 = vmatpush1.bf16.msra.mxu0 %v5723_v22 }
 0x3f0   : > { %3642 = vmatprep.subr.bf16.mxu0 %v5728_v30 }
 0x3f1   : > { %5093 = vmatpush3.bf16.msra.mxu1 %v5777_v34  ;;  %v5786_v34 = vld [vmem:[#allocation4 + $0xad4] ss:$12 sps:$4 sm:$0xff]  }
 0x3f2   : > { %5192 = vmatprep.subr.bf16.mxu1 %v6008_v45 }
 0x3f3   : > { %3643 = vmatpush1.bf16.msra.mxu0 %v5726_v23 }
 0x3f4   : > { %3644 = vmatprep.subr.bf16.mxu0 %v5731_v31 }
 0x3f7   : > { %3645 = vmatpush1.bf16.msra.mxu0 %v5729_v61 }
 0x3f8   : > { %3646 = vmatprep.subr.bf16.mxu0 %v5734_v24 }
 0x3fb   : > { %3647 = vmatpush1.bf16.msra.mxu0 %v5732_v25 }
 0x3fc   : > { %3648 = vmatprep.subr.bf16.mxu0 %v5737_v27 }
 0x3ff   : > { %3649 = vmatpush1.bf16.msra.mxu0 %v5735_v26 }
 0x400   : > { %3650 = vmatprep.subr.bf16.mxu0 %v5740_v28 }
 0x403   : > { %3651 = vmatpush1.bf16.msra.mxu0 %v5738_v35 }
 0x404   : > { %3652 = vmatprep.subr.bf16.mxu0 %v5745_v37 }
 0x407   : > { %3653 = vmatpush1.bf16.msra.mxu0 %v5743_v39 }
 0x408   : > { %3654 = vmatprep.subr.bf16.mxu0 %v5750_v40 }
 0x40b   : > { %3655 = vmatpush1.bf16.msra.mxu0 %v5748_v53  ;;  %v3213_v53 = vrot.slane %v6351_v41, 4 }
 0x40c   : > { %3656 = vmatprep.subr.bf16.mxu0 %v5755_v43 }
 0x40f   : > { %3657 = vmatpush1.bf16.msra.mxu0 %v5753_v46  ;;  %v3214_v46 = vrot.slane %v6354_v44, 4 }
 0x410   : > { %3658 = vmatprep.subr.bf16.mxu0 %v5760_v48 }
 0x413   : > { %3659 = vmatpush1.bf16.msra.mxu0 %v5758_v49 }
 0x414   : > { %3660 = vmatprep.subr.bf16.mxu0 %v5765_v50 }
 0x417   : > { %3661 = vmatpush1.bf16.msra.mxu0 %v5763_v51  ;;  %v5778_v51 = vld [vmem:[#allocation4 + $0xaa4] ss:$12 sps:$4 sm:$0xff]  }
 0x418   : > { %3662 = vmatprep.subr.bf16.mxu0 %v5770_v54 }
 0x41b   : > { %3663 = vmatpush1.bf16.msra.mxu0 %v5768_v58  ;;  %v3302_v58 = vld [vmem:[#allocation4 + $0xaec] sm:$0x11] }
 0x41c   : > { %3664 = vmatprep.subr.bf16.mxu0 %v5775_v60  ;;  %v5785_v60 = vld [vmem:[#allocation4 + $0xac4] ss:$12 sps:$4 sm:$0xff]  }
 0x41f   : > { %3665 = vmatpush1.bf16.msra.mxu0 %v5773_v63  ;;  %v4875_v63 = vcombine.high %v3302_v58, %v3302_v58 }
 0x420   : > { %3675 = vmatprep.subr.bf16.mxu0 %v5780_v0  ;;  %v5789_v0 = vld [vmem:[#allocation4 + $0xadc] ss:$12 sps:$4 sm:$0xff]  }
 0x455   : > { %v2637_v1 = vpop.f32.mrb[16].mxu0 }
 0x456   : > { %v2639_v3 = vpop.f32.mrb[17].mxu0 }
 0x457   : > { %v2596_v12 = vpop.f32.mrb[20].mxu1  ;;  %v2641_v4 = vpop.f32.mrb[18].mxu0 }
 0x458   : > { %v2638_v36 = vadd.f32 %v2637_v1, %v2596_v12  ;;  %v2598_v16 = vpop.f32.mrb[21].mxu1  ;;  %v2642_v5 = vpop.f32.mrb[19].mxu0  ;;  %v4874_v1 = vcombine.low %v3302_v58, %v3302_v58  ;;  %v6369_v12 = vld [vmem:[#allocation6 + $0x10] sm:$0xff] }
 0x459   : > { %v2640_v6 = vadd.f32 %v2639_v3, %v2598_v16  ;;  %v2600_v7 = vpop.f32.mrb[22].mxu1  ;;  %v5792_v3 = vld [vmem:[#allocation4 + $0xaf4] ss:$0 sps:$4 sm:$0x11]   ;;  %v3215_v4 = vrot.slane %v6369_v12, 4 }
 0x45a   : > { %v2601_v8 = vpop.f32.mrb[23].mxu1  ;;  %v3626_v16 = vand.u32 %v4874_v1, %v6197_v56  ;;  %v3632_v5 = vand.u32 %v5792_v3, %v6197_v56  ;;  %v5795_v7 = vld [vmem:[#allocation4 + $0xafc] ss:$12 sps:$4 sm:$0xff]  }
 0x45b   : > { %v5820_v8 = vld [vmem:[#allocation4 + $0xbc0] ss:$12 sps:$4 sm:$0xff]   ;;  %v5850_v58 = vld [vmem:[#allocation4 + $0xc50] ss:$12 sps:$4 sm:$0xff]  }
 0x45c   : > { %v5859_v1 = vld [vmem:[#allocation4 + $0xc7c] ss:$12 sps:$4 sm:$0xff]  }
 0x467   : > { %v2718_v9 = vpop.f32.mrb[24].mxu1 }
 0x468   : > { %v5178_v10 = vpop.f32.mrb[25].mxu1 }
 0x469   : > { %v2721_v11 = vpop.f32.mrb[26].mxu1  ;;  %v5821_v10 = vld [vmem:[#allocation4 + $0xb00] ss:$12 sps:$4 sm:$0xff]  }
 0x46a   : > { %v5179_v13 = vpop.f32.mrb[27].mxu1 }
 0x46b   : > { %v5798_v13 = vld [vmem:[#allocation4 + $0xb14] ss:$12 sps:$4 sm:$0xff]  }
 0x475   : > { %v5040_v17 = vpop.f32.mrb[20].mxu0 }
 0x476   : > { %v5041_v18 = vpop.f32.mrb[21].mxu0 }
 0x477   : > { %v5042_v19 = vadd.f32 %v5041_v18, %v5040_v17  ;;  %v3123_v20 = vpop.f32.mrb[28].mxu1  ;;  %v5043_v21 = vpop.f32.mrb[22].mxu0  ;;  %v5825_v17 = vld [vmem:[#allocation4 + $0xbd8] ss:$12 sps:$4 sm:$0xff]   ;;  %v5796_v18 = vld [vmem:[#allocation4 + $0xb10] ss:$12 sps:$4 sm:$0xff]  }
 0x478   : > { %v3125_v22 = vpop.f32.mrb[29].mxu1  ;;  %v5044_v30 = vpop.f32.mrb[23].mxu0  ;;  %v5799_v21 = vld [vmem:[#allocation4 + $0xb28] ss:$12 sps:$4 sm:$0xff]  }
 0x479   : > { %v2719_v23 = vadd.f32 %v5042_v19, %v2718_v9  ;;  %v3127_v31 = vpop.f32.mrb[30].mxu1  ;;  %v5793_v9 = vld [vmem:[#allocation4 + $0xaf8] ss:$12 sps:$4 sm:$0xff]   ;;  %v5802_v30 = vld [vmem:[#allocation4 + $0xb40] ss:$12 sps:$4 sm:$0xff]  }
 0x47a   : > { %v3128_v61 = vpop.f32.mrb[31].mxu1  ;;  %v5826_v19 = vld [vmem:[#allocation4 + $0xb18] ss:$12 sps:$4 sm:$0xff]  }
 0x47b   : > { %v5805_v31 = vld [vmem:[#allocation4 + $0xb58] ss:$12 sps:$4 sm:$0xff]   ;;  %v5810_v61 = vld [vmem:[#allocation4 + $0xb74] ss:$12 sps:$4 sm:$0xff]  }
 0x497   : > { %v5067_v24 = vpop.f32.mrb[32].mxu1 }
 0x498   : > { %v5068_v25 = vpop.f32.mrb[33].mxu1 }
 0x499   : > { %v5069_v26 = vadd.f32 %v5068_v25, %v5067_v24  ;;  %v5070_v27 = vpop.f32.mrb[34].mxu1  ;;  %v5808_v24 = vld [vmem:[#allocation4 + $0xb70] ss:$12 sps:$4 sm:$0xff]   ;;  %v5813_v25 = vld [vmem:[#allocation4 + $0xb8c] ss:$12 sps:$4 sm:$0xff]  }
 0x49a   : > { %v5071_v28 = vpop.f32.mrb[35].mxu1  ;;  %v5816_v27 = vld [vmem:[#allocation4 + $0xba4] ss:$12 sps:$4 sm:$0xff]  }
 0x49b   : > { %v3165_v29 = vadd.f32 %v5069_v26, %v2719_v23  ;;  %v5807_v23 = vld [vmem:[#allocation4 + $0xb5c] ss:$12 sps:$4 sm:$0xff]   ;;  %v5814_v28 = vld [vmem:[#allocation4 + $0xba0] ss:$12 sps:$4 sm:$0xff]  }
 0x49c   : > { %v5811_v26 = vld [vmem:[#allocation4 + $0xb88] ss:$12 sps:$4 sm:$0xff]  }
 0x4a7   : > { %v3204_v32 = vpop.f32.mrb[36].mxu1 }
 0x4a8   : > { %v3205_v33 = vadd.f32 %v3204_v32, %v3165_v29  ;;  %v5190_v35 = vpop.f32.mrb[37].mxu1  ;;  %v5819_v29 = vld [vmem:[#allocation4 + $0xbbc] ss:$12 sps:$4 sm:$0xff]   ;;  %v5817_v32 = vld [vmem:[#allocation4 + $0xbb8] ss:$12 sps:$4 sm:$0xff]  }
 0x4a9   : > { %v3207_v37 = vpop.f32.mrb[38].mxu1  ;;  %v5822_v35 = vld [vmem:[#allocation4 + $0xbd0] ss:$12 sps:$4 sm:$0xff]  }
 0x4aa   : > { %v5191_v38 = vpop.f32.mrb[39].mxu1  ;;  %v5829_v37 = vld [vmem:[#allocation4 + $0xbec] ss:$12 sps:$4 sm:$0xff]  }
 0x4ab   : > { %v5830_v38 = vld [vmem:[#allocation4 + $0xbf0] ss:$12 sps:$4 sm:$0xff]  }
 0x4b5   : > { %v3082_v39 = vpop.f32.mrb[24].mxu0 }
 0x4b6   : > { %v3083_v40 = vadd.f32 %v3082_v39, %v2638_v36  ;;  %v3084_v42 = vpop.f32.mrb[25].mxu0  ;;  %v3629_v36 = vand.u32 %v4875_v63, %v6197_v56  ;;  %v5827_v39 = vld [vmem:[#allocation4 + $0xbe8] ss:$12 sps:$4 sm:$0xff]  }
 0x4b7   : > { %v3085_v43 = vadd.f32 %v3084_v42, %v2640_v6  ;;  %v3086_v47 = vpop.f32.mrb[26].mxu0  ;;  %v6376_v6 = vadd.f32 %v3215_v4, %v3205_v33  ;;  %v5824_v33 = vld [vmem:[#allocation4 + $0xbd4] ss:$12 sps:$4 sm:$0xff]  }
 0x4b8   : > { %v3124_v48 = vadd.f32 %v3123_v20, %v3083_v40  ;;  %v3087_v2 = vpop.f32.mrb[27].mxu0  ;;  %v5801_v20 = vld [vmem:[#allocation4 + $0xb2c] ss:$12 sps:$4 sm:$0xff]   ;;  %v5831_v40 = vld [vmem:[#allocation4 + $0xb30] ss:$12 sps:$4 sm:$0xff]  }
 0x4b9   : > { %v3126_v49 = vadd.f32 %v3125_v22, %v3085_v43  ;;  %v3224_v11 = vpack.c.bf16 %v6376_v6, %v6376_v6  ;;  %v5804_v22 = vld [vmem:[#allocation4 + $0xb44] ss:$12 sps:$4 sm:$0xff]   ;;  %v5835_v42 = vld [vmem:[#allocation4 + $0xc08] ss:$12 sps:$4 sm:$0xff]   ;;  %v5832_v43 = vld [vmem:[#allocation4 + $0xc00] ss:$12 sps:$4 sm:$0xff]  }
 0x4ba   : > { %v6357_v14 = vadd.f32 %v3213_v53, %v3124_v48  ;;  %v5834_v53 = vld [vmem:[#allocation4 + $0xc04] ss:$12 sps:$4 sm:$0xff]   ;;  %v5839_v47 = vld [vmem:[#allocation4 + $0xc1c] ss:$12 sps:$4 sm:$0xff]   ;;  %v5840_v48 = vld [vmem:[#allocation4 + $0xc20] ss:$12 sps:$4 sm:$0xff]  }
 0x4bb   : > { %v6359_v50 = vadd.f32 %v3214_v46, %v3126_v49  ;;  %v5836_v46 = vld [vmem:[#allocation4 + $0xb48] ss:$12 sps:$4 sm:$0xff]   ;;  %v5837_v2 = vld [vmem:[#allocation4 + $0xc18] ss:$12 sps:$4 sm:$0xff]   ;;  %v5841_v49 = vld [vmem:[#allocation4 + $0xb60] ss:$12 sps:$4 sm:$0xff]  }
 0x4bc   : > { %v3222_v54 = vpack.c.bf16 %v6357_v14, %v6357_v14  ;;  %v5855_v63 = vld [vmem:[#allocation4 + $0xc68] ss:$12 sps:$4 sm:$0xff]  }
 0x4bd   : > { %v3223_v15 = vpack.c.bf16 %v6359_v50, %v6359_v50 }
 0x4bf   : > { %3666 = vmatprep.mubr.bf16.mxu0 %v3223_v15  ;;  %3748 = vmatprep.mubr.bf16.mxu1 %v3223_v15  ;;  %v5844_v15 = vld [vmem:[#allocation4 + $0xc34] ss:$12 sps:$4 sm:$0xff]  }
 0x4c0   : > { %3667 = vmatmul.mubr.bf16.vlgmr.msra.gmra.mrb[28].mxu0 %v3222_v54  ;;  %3749 = vmatmul.mubr.bf16.vlgmr.msra.gmra.mrb[40].mxu1 %v3222_v54  ;;  %v5846_v54 = vld [vmem:[#allocation4 + $0xb78] ss:$12 sps:$4 sm:$0xff]  }
 0x4c1   : > { %3676 = vmatpush1.bf16.msra.mxu0 %v5778_v51  ;;  %5193 = vmatpush3.bf16.msra.mxu1 %v5781_v52  ;;  %v5845_v51 = vld [vmem:[#allocation4 + $0xc38] ss:$12 sps:$4 sm:$0xff]   ;;  %v5842_v52 = vld [vmem:[#allocation4 + $0xc30] ss:$12 sps:$4 sm:$0xff]  }
 0x4c2   : > { %3677 = vmatprep.subr.bf16.mxu0 %v5784_v57  ;;  %5194 = vmatprep.subr.bf16.mxu1 %v6008_v45  ;;  %v5849_v57 = vld [vmem:[#allocation4 + $0xc4c] ss:$12 sps:$4 sm:$0xff]  }
 0x4c3   : > { %3707 = vmatprep.mubr.bf16.mxu0 %v6010_v55  ;;  %5200 = vmatprep.mubr.msk.bf16.mxu1 %vm6009_vm0, %v6008_v45 }
 0x4c5   : > { %3678 = vmatpush1.bf16.msra.mxu0 %v5782_v59  ;;  %5195 = vmatpush3.bf16.msra.mxu1 %v5785_v60  ;;  %v5847_v59 = vld [vmem:[#allocation4 + $0xc48] ss:$12 sps:$4 sm:$0xff]   ;;  %v5851_v60 = vld [vmem:[#allocation4 + $0xb90] ss:$12 sps:$4 sm:$0xff]  }
 0x4c6   : > { %3679 = vmatprep.subr.bf16.mxu0 %v5788_v62  ;;  %5196 = vmatprep.subr.bf16.mxu1 %v6008_v45  ;;  %v5854_v62 = vld [vmem:[#allocation4 + $0xc64] ss:$12 sps:$4 sm:$0xff]  }
 0x4c9   : > { %3680 = vmatpush1.bf16.msra.mxu0 %v5786_v34  ;;  %5197 = vmatpush3.bf16.msra.mxu1 %v5789_v0  ;;  %v5852_v34 = vld [vmem:[#allocation4 + $0xc60] ss:$12 sps:$4 sm:$0xff]   ;;  %v5856_v0 = vld [vmem:[#allocation4 + $0xba8] ss:$12 sps:$4 sm:$0xff]  }
 0x4ca   : > { %3681 = vmatprep.subr.bf16.mxu0 %v3629_v36  ;;  %5198 = vmatprep.subr.bf16.mxu1 %v6008_v45 }
 0x4cd   : > { %3682 = vmatpush1.bf16.msra.mxu0 %v3626_v16  ;;  %5199 = vmatpush3.bf16.msra.mxu1 %v3632_v5 }
 0x4ce   : > { %4220 = vmatprep.subr.bf16.mxu1 %v5795_v7  ;;  %5105 = vmatprep.subr.bf16.mxu0 %v5820_v8  ;;  %v3618_v7 = vrot.slane %v6369_v12, 5  ;;  %v3616_v8 = vrot.slane %v6351_v41, 5 }
 0x4d0   : > { %4877 = vmatmul.mubr.msk.bf16.vlgmr.msra.gmra.mrb[28].mxu0 %vm653_vm2, %v3224_v11  ;;  %5201 = vmatmul.mubr.msk.bf16.vlgmr.msra.gmra.mrb[44].mxu1 %vm653_vm2, %v3224_v11 }
 0x4d1   : > { %4221 = vmatpush1.bf16.msra.mxu1 %v5793_v9  ;;  %5106 = vmatpush3.bf16.msra.mxu0 %v5821_v10  ;;  %v3617_v9 = vrot.slane %v6354_v44, 5 }
 0x4d2   : > { %4222 = vmatprep.subr.bf16.mxu1 %v5798_v13  ;;  %5107 = vmatprep.subr.bf16.mxu0 %v5825_v17 }
 0x4d5   : > { %4223 = vmatpush1.bf16.msra.mxu1 %v5796_v18  ;;  %5108 = vmatpush3.bf16.msra.mxu0 %v5826_v19 }
 0x4d6   : > { %4224 = vmatprep.subr.bf16.mxu1 %v5801_v20  ;;  %5109 = vmatprep.subr.bf16.mxu0 %v5830_v38  ;;  %v3888_v38 = vld [vmem:[#allocation4 + $0xcc0] sm:$0x11] }
 0x4d9   : > { %4225 = vmatpush1.bf16.msra.mxu1 %v5799_v21  ;;  %5110 = vmatpush3.bf16.msra.mxu0 %v5831_v40  ;;  %v5864_v40 = vld [vmem:[#allocation4 + $0xc98] ss:$12 sps:$4 sm:$0xff]  }
 0x4da   : > { %4226 = vmatprep.subr.bf16.mxu1 %v5804_v22  ;;  %5111 = vmatprep.subr.bf16.mxu0 %v5835_v42  ;;  %v4937_v42 = vcombine.high %v3888_v38, %v3888_v38 }
 0x4dd   : > { %4227 = vmatpush1.bf16.msra.mxu1 %v5802_v30  ;;  %5112 = vmatpush3.bf16.msra.mxu0 %v5836_v46  ;;  %v5865_v46 = vld [vmem:[#allocation4 + $0xca8] ss:$12 sps:$4 sm:$0xff]  }
 0x4de   : > { %4228 = vmatprep.subr.bf16.mxu1 %v5807_v23  ;;  %5113 = vmatprep.subr.bf16.mxu0 %v5840_v48  ;;  %v4936_v48 = vcombine.low %v3888_v38, %v3888_v38 }
 0x4e1   : > { %4229 = vmatpush1.bf16.msra.mxu1 %v5805_v31  ;;  %5114 = vmatpush3.bf16.msra.mxu0 %v5841_v49  ;;  %v4215_v49 = vand.u32 %v4937_v42, %v6197_v56 }
 0x4e2   : > { %4230 = vmatprep.subr.bf16.mxu1 %v5810_v61  ;;  %5115 = vmatprep.subr.bf16.mxu0 %v5845_v51 }
 0x4e5   : > { %4231 = vmatpush1.bf16.msra.mxu1 %v5808_v24  ;;  %5116 = vmatpush3.bf16.msra.mxu0 %v5846_v54 }
 0x4e6   : > { %4232 = vmatprep.subr.bf16.mxu1 %v5813_v25  ;;  %5117 = vmatprep.subr.bf16.mxu0 %v5850_v58 }
 0x4e9   : > { %4233 = vmatpush1.bf16.msra.mxu1 %v5811_v26  ;;  %5118 = vmatpush3.bf16.msra.mxu0 %v5851_v60 }
 0x4ea   : > { %4234 = vmatprep.subr.bf16.mxu1 %v5816_v27  ;;  %5119 = vmatprep.subr.bf16.mxu0 %v5855_v63  ;;  %v4204_v63 = vrot.slane %v6369_v12, 6 }
 0x4ed   : > { %4235 = vmatpush1.bf16.msra.mxu1 %v5814_v28  ;;  %5120 = vmatpush3.bf16.msra.mxu0 %v5856_v0 }
 0x4ee   : > { %4236 = vmatprep.subr.bf16.mxu1 %v5819_v29  ;;  %5204 = vmatprep.subr.bf16.mxu0 %v6008_v45 }
 0x4f1   : > { %4237 = vmatpush1.bf16.msra.mxu1 %v5817_v32  ;;  %v5857_v32 = vld [vmem:[#allocation4 + $0xc78] ss:$12 sps:$4 sm:$0xff]  }
 0x4f2   : > { %4238 = vmatprep.subr.bf16.mxu1 %v5824_v33  ;;  %v5860_v33 = vld [vmem:[#allocation4 + $0xc80] ss:$12 sps:$4 sm:$0xff]  }
 0x4f5   : > { %4239 = vmatpush1.bf16.msra.mxu1 %v5822_v35 }
 0x4f6   : > { %4240 = vmatprep.subr.bf16.mxu1 %v5829_v37  ;;  %v5863_v37 = vld [vmem:[#allocation4 + $0xc94] ss:$12 sps:$4 sm:$0xff]  }
 0x4f9   : > { %4241 = vmatpush1.bf16.msra.mxu1 %v5827_v39  ;;  %v5861_v39 = vld [vmem:[#allocation4 + $0xc90] ss:$12 sps:$4 sm:$0xff]  }
 0x4fa   : > { %4242 = vmatprep.subr.bf16.mxu1 %v5834_v53  ;;  %v5867_v53 = vld [vmem:[#allocation4 + $0xcac] ss:$12 sps:$4 sm:$0xff]  }
 0x4fd   : > { %4243 = vmatpush1.bf16.msra.mxu1 %v5832_v43 }
 0x4fe   : > { %4244 = vmatprep.subr.bf16.mxu1 %v5839_v47  ;;  %v5868_v47 = vld [vmem:[#allocation4 + $0xcb0] ss:$12 sps:$4 sm:$0xff]  }
 0x501   : > { %4245 = vmatpush1.bf16.msra.mxu1 %v5837_v2  ;;  %v5871_v2 = vld [vmem:[#allocation4 + $0xcc8] ss:$0 sps:$4 sm:$0x11]  }
 0x502   : > { %4246 = vmatprep.subr.bf16.mxu1 %v5844_v15  ;;  %v4218_v51 = vand.u32 %v5871_v2, %v6197_v56 }
 0x505   : > { %4247 = vmatpush1.bf16.msra.mxu1 %v5842_v52 }
 0x506   : > { %4248 = vmatprep.subr.bf16.mxu1 %v5849_v57 }
 0x509   : > { %4249 = vmatpush1.bf16.msra.mxu1 %v5847_v59 }
 0x50a   : > { %4250 = vmatprep.subr.bf16.mxu1 %v5854_v62 }
 0x50d   : > { %4251 = vmatpush1.bf16.msra.mxu1 %v5852_v34  ;;  %v4203_v34 = vrot.slane %v6354_v44, 6 }
 0x50e   : > { %4261 = vmatprep.subr.bf16.mxu1 %v5859_v1 }
 0x593   : > { %v5094_v3 = vpop.f32.mrb[40].mxu1 }
 0x594   : > { %v5095_v4 = vpop.f32.mrb[41].mxu1 }
 0x595   : > { %v5096_v36 = vadd.f32 %v5095_v4, %v5094_v3  ;;  %v5097_v16 = vpop.f32.mrb[42].mxu1 }
 0x596   : > { %v5098_v5 = vpop.f32.mrb[43].mxu1 }
 0x597   : > { %v3751_v10 = vadd.f32 %v5096_v36, %v3618_v7 }
 0x5a3   : > { %v3709_v11 = vpop.f32.mrb[28].mxu0  ;;  %v3790_v13 = vpop.f32.mrb[44].mxu1 }
 0x5a4   : > { %v5222_v17 = vadd.f32 %v3709_v11, %v3616_v8  ;;  %v3791_v18 = vadd.f32 %v3790_v13, %v3751_v10  ;;  %v3711_v19 = vpop.f32.mrb[29].mxu0  ;;  %v5202_v20 = vpop.f32.mrb[45].mxu1 }
 0x5a5   : > { %v5223_v21 = vadd.f32 %v3711_v19, %v3617_v9  ;;  %v3713_v22 = vpop.f32.mrb[30].mxu0  ;;  %v3793_v30 = vpop.f32.mrb[46].mxu1 }
 0x5a6   : > { %vm3796_vm13 = vcmp.gt.f32.partialorder %v5222_v17, 0.0  ;;  %v3799_v23 = vmul.f32 0.01, %v5222_v17  ;;  %v3714_v61 = vpop.f32.mrb[31].mxu0  ;;  %v5203_v24 = vpop.f32.mrb[47].mxu1  ;;  %vm3798_vm15 = vcmp.gt.f32.partialorder %v3791_v18, 0.0 }
 0x5a7   : > { %vm3797_vm14 = vcmp.gt.f32.partialorder %v5223_v21, 0.0  ;;  %v3800_v31 = vmul.f32 0.01, %v5223_v21  ;;  %v3801_v43 = vmul.f32 0.01, %v3791_v18  ;;  %v4397_v30 = vrot.slane %v6351_v41, 7 }
 0x5a8   : > { %v6387_v25 = vsel %vm3796_vm13, %v5222_v17, %v3799_v23  ;;  %v4399_v61 = vrot.slane %v6369_v12, 7  ;;  %v218_v12 = vld [vmem:[#allocation6 + $0x18] sm:$0x1] }
 0x5a9   : > { %v3805_v26 = vadd.f32 %v6387_v25, %v6357_v14  ;;  %v6391_v27 = vsel %vm3797_vm14, %v5223_v21, %v3800_v31  ;;  %v3804_v15 = vsel %vm3798_vm15, %v3791_v18, %v3801_v43  ;;  %v4398_v31 = vrot.slane %v6354_v44, 7 }
 0x5aa   : > { %v3806_v28 = vadd.f32 %v6391_v27, %v6359_v50  ;;  %v3807_v52 = vadd.f32 %v3804_v15, %v6376_v6 }
 0x5ab   : > { %v3808_v35 = vpack.c.bf16 %v3805_v26, %v3805_v26 }
 0x5ac   : > { %v3809_v29 = vpack.c.bf16 %v3806_v28, %v3806_v28  ;;  %v3810_v54 = vpack.c.bf16 %v3807_v52, %v3807_v52 }
 0x5ae   : > { %4252 = vmatprep.mubr.bf16.mxu1 %v3809_v29  ;;  %4334 = vmatprep.mubr.bf16.mxu0 %v3809_v29 }
 0x5af   : > { %4253 = vmatmul.mubr.bf16.vlgmr.msra.gmra.mrb[48].mxu1 %v3808_v35  ;;  %4335 = vmatmul.mubr.bf16.vlgmr.msra.gmra.mrb[32].mxu0 %v3808_v35 }
 0x5b0   : > { %4262 = vmatpush1.bf16.msra.mxu1 %v5857_v32  ;;  %5205 = vmatpush3.bf16.msra.mxu0 %v5860_v33 }
 0x5b1   : > { %4263 = vmatprep.subr.bf16.mxu1 %v5863_v37  ;;  %5206 = vmatprep.subr.bf16.mxu0 %v6008_v45 }
 0x5b2   : > { %4293 = vmatprep.mubr.bf16.mxu1 %v6010_v55  ;;  %5212 = vmatprep.mubr.msk.bf16.mxu0 %vm6009_vm0, %v6008_v45  ;;  %v4212_v55 = vand.u32 %v4936_v48, %v6197_v56  ;;  %v4202_v56 = vrot.slane %v6351_v41, 6 }
 0x5b4   : > { %4264 = vmatpush1.bf16.msra.mxu1 %v5861_v39  ;;  %5207 = vmatpush3.bf16.msra.mxu0 %v5864_v40 }
 0x5b5   : > { %4265 = vmatprep.subr.bf16.mxu1 %v5867_v53  ;;  %5208 = vmatprep.subr.bf16.mxu0 %v6008_v45 }
 0x5b8   : > { %4266 = vmatpush1.bf16.msra.mxu1 %v5865_v46  ;;  %5209 = vmatpush3.bf16.msra.mxu0 %v5868_v47 }
 0x5b9   : > { %4267 = vmatprep.subr.bf16.mxu1 %v4215_v49  ;;  %5210 = vmatprep.subr.bf16.mxu0 %v6008_v45 }
 0x5bc   : > { %4268 = vmatpush1.bf16.msra.mxu1 %v4212_v55  ;;  %5211 = vmatpush3.bf16.msra.mxu0 %v4218_v51 }
 0x5bf   : > { %4939 = vmatmul.mubr.msk.bf16.vlgmr.msra.gmra.mrb[48].mxu1 %vm653_vm2, %v3810_v54  ;;  %5213 = vmatmul.mubr.msk.bf16.vlgmr.msra.gmra.mrb[36].mxu0 %vm653_vm2, %v3810_v54 }
 0x682   : > { %v5121_v57 = vpop.f32.mrb[32].mxu0 }
 0x683   : > { %v5122_v58 = vpop.f32.mrb[33].mxu0 }
 0x684   : > { %v5123_v59 = vadd.f32 %v5122_v58, %v5121_v57  ;;  %v5124_v60 = vpop.f32.mrb[34].mxu0 }
 0x685   : > { %v5125_v62 = vpop.f32.mrb[35].mxu0 }
 0x686   : > { %v4337_v0 = vadd.f32 %v5123_v59, %v4204_v63 }
 0x692   : > { %v4295_v45 = vpop.f32.mrb[48].mxu1  ;;  %v4376_v1 = vpop.f32.mrb[36].mxu0 }
 0x693   : > { %v5224_v3 = vadd.f32 %v4295_v45, %v4202_v56  ;;  %v4377_v4 = vadd.f32 %v4376_v1, %v4337_v0  ;;  %v4297_v36 = vpop.f32.mrb[49].mxu1  ;;  %v5214_v16 = vpop.f32.mrb[37].mxu0 }
 0x694   : > { %v5225_v5 = vadd.f32 %v4297_v36, %v4203_v34  ;;  %v4299_v7 = vpop.f32.mrb[50].mxu1  ;;  %v4379_v8 = vpop.f32.mrb[38].mxu0 }
 0x695   : > { %vm4382_vm0 = vcmp.gt.f32.partialorder %v5224_v3, 0.0  ;;  %v4385_v9 = vmul.f32 0.01, %v5224_v3  ;;  %vm4384_vm2 = vcmp.gt.f32.partialorder %v4377_v4, 0.0  ;;  %v4387_v10 = vmul.f32 0.01, %v4377_v4 }
 0x696   : > { %vm4383_vm3 = vcmp.gt.f32.partialorder %v5225_v5, 0.0  ;;  %v4386_v11 = vmul.f32 0.01, %v5225_v5  ;;  %v4300_v13 = vpop.f32.mrb[51].mxu1  ;;  %v5215_v17 = vpop.f32.mrb[39].mxu0 }
 0x697   : > { %v4388_v18 = vsel %vm4382_vm0, %v5224_v3, %v4385_v9  ;;  %v4390_v19 = vsel %vm4384_vm2, %v4377_v4, %v4387_v10 }
 0x698   : > { %v4391_v20 = vadd.f32 %v4388_v18, %v6387_v25  ;;  %v4393_v21 = vadd.f32 %v4390_v19, %v3804_v15  ;;  %v4389_v22 = vsel %vm4383_vm3, %v5225_v5, %v4386_v11 }
 0x699   : > { %v4392_v23 = vadd.f32 %v4389_v22, %v6391_v27 }
 0x69a   : > { %v4394_v24 = vadd.f32 %v4391_v20, %v6357_v14  ;;  %v4396_v26 = vadd.f32 %v4393_v21, %v6376_v6 }
 0x69b   : > { %v4395_v28 = vadd.f32 %v4392_v23, %v6359_v50 }
 0x69c   : > { %v4403_v29 = vmul.f32 %v4397_v30, %v4394_v24  ;;  %v4405_v32 = vmul.f32 %v4399_v61, %v4396_v26 }
 0x69d   : > { %v4404_v25 = vmul.f32 %v4398_v31, %v4395_v28 }
 0x69e   : > { %v4406_v33 = vsel %vm657_vm1, %v4403_v29, 0.0  ;;  %v4410_v35 = vsel %vm4409_vm4, %v4405_v32, 0.0 }
 0x69f   : > { %v4407_v41 = vsel %vm657_vm1, %v4404_v25, 0.0 }
 0x6a0   : > { %v4408_v27 = vadd.f32 %v4407_v41, %v4406_v33 }
 0x6a2   : > { %v4411_v44 = vadd.f32 %v4410_v35, %v4408_v27 }
 0x6a4   : > { %4412 = vadd.xlane.f32.xlu0 %v4411_v44 }
 0x731   : > { %v4413_v14 = vpop.xlane.xlu0 %4412 }
 0x732   : > { %v4414_v50 = vadd.f32 %v4413_v14, %v218_v12 }
 0x734   : > { %4416 = vst.msk [vmem:[%s213_s21] sm:$0x1] %vm4415_vm5, %v4414_v50 }
 0x735 PF: > { %p14_p9 = scmp.ge.s32.totalorder %s6124_s29, 6   ;;  %s6453_s12 = smov %s5991_s13 }
 0x736   : > { %s6454_s13 = smov %s5995_s14  ;;  %s6455_s14 = smov %s6133_s5 }
 0x737   : > { %s6456_s15 = smov %s6124_s29  ;;  %16 = sbr.rel (!%p14_p9) target bundleno = 4 (0x4), region = 86 }
 0x73e   :  { %4434 = vsyncpa [#allocation3], 1 }
 0x73f   :  { %4436 = vsyncpa [#allocation3 + $0x1], 1 }
 0x740   :  { %4437 = vsyncpa [#allocation5], 1 }

</bundles_post_ra>
